<compile_context>
chip_gen: v7x
topology: tpu7x:2x2x1
jax: 0.10.0
libtpu: 0.0.40
codegen_flags: <defaults>
</compile_context>

<pallas_src>
import numpy as np
import jax
import jax.numpy as jnp
from jax.experimental import pallas as pl
from jax.experimental.pallas import tpu as pltpu


# -----------------------------------------------------------------------------
# Weight preparation: fold BN, lower convs to dense matrices, fold linear chains
# -----------------------------------------------------------------------------
def _bn_fold(gamma, beta, mean, var, eps=1e-5):
    gamma, beta, mean, var = (np.asarray(v, np.float32) for v in (gamma, beta, mean, var))
    scale = gamma / np.sqrt(var + eps)
    shift = beta - mean * scale
    return scale, shift


def _conv1d_dense(w, L_in, stride, pad, scale=None):
    """Dense M s.t. flat(Conv1d(x, w)) == flat(x) @ M, channel-major flatten.
    w: PyTorch layout (Cout, Cin, K), bias=False."""
    w = np.asarray(w, np.float32)
    Cout, Cin, K = w.shape
    L_out = (L_in + 2 * pad - K) // stride + 1
    M = np.zeros((Cin, L_in, Cout, L_out), np.float32)
    for lo in range(L_out):
        for k in range(K):
            li = lo * stride + k - pad
            if 0 <= li < L_in:
                M[:, li, :, lo] += w[:, :, k].T          # (Cin, Cout)
    M = M.reshape(Cin * L_in, Cout * L_out)
    if scale is not None:                                 # fold BN scale into columns
        M = M * np.repeat(np.asarray(scale, np.float32), L_out)[None, :]
    return M, L_out


def _conv_transpose1d_dense(w, L_in, stride, pad, scale=None):
    """Dense M for ConvTranspose1d. w: PyTorch layout (Cin, Cout, K), bias=False,
    output_padding=0."""
    w = np.asarray(w, np.float32)
    Cin, Cout, K = w.shape
    L_out = (L_in - 1) * stride - 2 * pad + K
    M = np.zeros((Cin, L_in, Cout, L_out), np.float32)
    for li in range(L_in):
        for k in range(K):
            lo = li * stride + k - pad
            if 0 <= lo < L_out:
                M[:, li, :, lo] += w[:, :, k]             # (Cin, Cout)
    M = M.reshape(Cin * L_in, Cout * L_out)
    if scale is not None:
        M = M * np.repeat(np.asarray(scale, np.float32), L_out)[None, :]
    return M, L_out


_KERNEL_WEIGHT_ORDER = (
    "W1", "b1", "W2", "W3", "b3",
    "We", "be", "Wrf", "brf", "Wed", "bed",
    "Wd1", "bd1", "Wd2", "bd2", "Wd3",
)


def prepare_weights(p, num_hiddens, kernel_size, data_len):
    H, K, L = num_hiddens, kernel_size, data_len
    L2, L4, L8 = L // 2, L // 4, L // 8

    s1, sh1 = _bn_fold(**p["bn1"])
    s3, sh3 = _bn_fold(**p["bn3"])
    sd1, shd1 = _bn_fold(**p["bnd1"])
    sd2, shd2 = _bn_fold(**p["bnd2"])

    W1, l1 = _conv1d_dense(p["conv1_w"], L,  2, K // 2 - 1,      scale=s1)
    W2, l2 = _conv1d_dense(p["conv2_w"], L2, 2, K // 2 // 2 - 1)            # no BN on conv2
    W3, l3 = _conv1d_dense(p["conv3_w"], L4, 2, K // 4 // 2 - 1, scale=s3)
    Wd1, ld1 = _conv_transpose1d_dense(p["deconv1_w"], L8, 2, K // 4 // 2 - 1, scale=sd1)
    Wd2, ld2 = _conv_transpose1d_dense(p["deconv2_w"], L4, 2, K // 2 // 2 - 1, scale=sd2)
    Wd3, ld3 = _conv_transpose1d_dense(p["deconv3_w"], L2, 2, K // 2 - 1)

    # output_padding=0 assumption check: lengths must chain back up to data_len
    assert (l1, l2, l3) == (L2, L4, L8) and (ld1, ld2, ld3) == (L4, L2, L)

    # ---- fold the purely-linear chains (exact; no nonlinearity between them) in f32 ----
    f32 = lambda a: np.asarray(a, np.float32)
    We, be = f32(p["enc_lin_w"]), f32(p["enc_lin_b"])
    Wr1, br1 = f32(p["reg1_w"]), f32(p["reg1_b"])
    Wr2, br2 = f32(p["reg2_w"]), f32(p["reg2_b"])
    Wd_lin, bd_lin = f32(p["dec_lin_w"]), f32(p["dec_lin_b"])

    Wrf = We @ Wr1 @ Wr2                                 # (enc_flat, 6)
    brf = (be @ Wr1 + br1) @ Wr2 + br2                   # (6,)
    Wed = We @ Wd_lin                                    # (enc_flat, enc_flat)
    bed = be @ Wd_lin + bd_lin                           # (enc_flat,)

    def wgt(a):    # MXU operand -> bf16 (f32 accumulation happens in-kernel)
        return jnp.asarray(np.asarray(a, np.float32), jnp.bfloat16)

    def bias(a):   # f32 epilogue row (1, width)
        return jnp.asarray(np.asarray(a, np.float32).reshape(1, -1), jnp.float32)

    mats = {
        "W1": wgt(W1), "b1": bias(np.repeat(sh1, L2)),
        "W2": wgt(W2),
        "W3": wgt(W3), "b3": bias(np.repeat(sh3, L8)),
        "We": wgt(We), "be": bias(be),
        "Wrf": wgt(Wrf), "brf": bias(brf),
        "Wed": wgt(Wed), "bed": bias(bed),
        "Wd1": wgt(Wd1), "bd1": bias(np.repeat(shd1, L4)),
        "Wd2": wgt(Wd2), "bd2": bias(np.repeat(shd2, L2)),
        "Wd3": wgt(Wd3),
    }
    return {"mats": mats, "data_len": L, "latent_dim": int(We.shape[1])}


# -----------------------------------------------------------------------------
# The single fused Pallas kernel: whole forward pass for one tile of batch rows
# -----------------------------------------------------------------------------
def _fused_autoencoder_kernel(
        x_ref,
        w1_ref, b1_ref, w2_ref, w3_ref, b3_ref,
        we_ref, be_ref, wrf_ref, brf_ref, wed_ref, bed_ref,
        wd1_ref, bd1_ref, wd2_ref, bd2_ref, wd3_ref,
        out_ref):

    def leaky(v):                                   # LeakyReLU(0.01), f32 epilogue
        return jnp.where(v >= 0, v, jnp.float32(0.01) * v)

    def mm(a, w_ref, b_ref=None):                   # bf16 MXU matmul, f32 accumulate
        y = jnp.dot(a.astype(w_ref.dtype), w_ref[...],
                    preferred_element_type=jnp.float32)
        if b_ref is not None:
            y = y + b_ref[...]                      # folded BN shift / linear bias
        return y

    x = x_ref[...]                                  # (TM, L) bf16

    # ---- encoder: conv1(+BN) -> conv2 -> conv3(+BN) (LeakyReLU each, Dropout=id) ----
    h = leaky(mm(x, w1_ref, b1_ref))                # (TM, H/2 * L/2)
    h = leaky(mm(h, w2_ref))                        # (TM, H   * L/4)   (no BN on conv2)
    h = leaky(mm(h, w3_ref, b3_ref))                # (TM, H   * L/8) == Flatten layout

    # ---- three independent heads off the flattened encoder activation ----
    latent = mm(h, we_ref, be_ref)                  # (TM, latent_dim)
    freq = jax.nn.sigmoid(mm(h, wrf_ref, brf_ref))  # (TM, 6)   folded Linear->Linear
    d = mm(h, wed_ref, bed_ref)                     # (TM, H*L/8)  folded enc_lin->dec_lin

    # ---- decoder: 3x ConvT(+BN) -> LeakyReLU -> Trim -> Sigmoid ----
    d = leaky(mm(d, wd1_ref, bd1_ref))              # (TM, H   * L/4)
    d = leaky(mm(d, wd2_ref, bd2_ref))              # (TM, H/2 * L/2)
    dec = jax.nn.sigmoid(leaky(mm(d, wd3_ref)))     # (TM, L)

    # ---- pack outputs into one lane-dense slab: [latent | freq | dec | zero-pad] ----
    lat_w = we_ref.shape[1]
    frq_w = wrf_ref.shape[1]
    dec_w = wd3_ref.shape[1]
    tot = lat_w + frq_w + dec_w
    out_ref[:, 0:lat_w] = latent
    out_ref[:, lat_w:lat_w + frq_w] = freq
    out_ref[:, lat_w + frq_w:tot] = dec
    if out_ref.shape[1] > tot:                      # static pad columns -> defined zeros
        out_ref[:, tot:] = jnp.zeros(
            (out_ref.shape[0], out_ref.shape[1] - tot), jnp.float32)


def _round_up(a, b):
    return (a + b - 1) // b * b


def _select_batch_tile(n8):
    """Generation-aware batch tile: 128 on v5e/older, 256 on v6e/v7x; on v7x split
    the batch so the 'parallel' grid axis can feed both TensorCores."""
    try:
        kind = jax.devices()[0].device_kind.lower()
    except Exception:
        kind = ""
    cap = 128 if ("v5" in kind or "v4" in kind or "v3" in kind or "v2" in kind) else 256
    dual_tc = ("v7" in kind) or ("7x" in kind)
    if dual_tc and n8 >= 16:
        tm = min(cap, _round_up(-(-n8 // 2), 8))     # grid >= 2 so both TCs get work
    else:
        tm = min(cap, n8)
    return tm


def autoencoder_forward(prep, x):
    """x: (N, 1, data_len). Returns (latent, None, None, freq, decoder) like the module."""
    mats, L, latent_dim = prep["mats"], prep["data_len"], prep["latent_dim"]
    N = x.shape[0]
    assert x.shape[1] == 1 and x.shape[2] == L

    n8 = _round_up(max(N, 1), 8)
    tm = _select_batch_tile(n8)
    n_pad = _round_up(n8, tm)

    x_flat = x.reshape(N, L)
    if n_pad != N:
        x_flat = jnp.pad(x_flat, ((0, n_pad - N), (0, 0)))
    x_flat = x_flat.astype(jnp.bfloat16)

    weights = [mats[k] for k in _KERNEL_WEIGHT_ORDER]

    # lane-dense packed output: [latent | freq | dec | pad] -> width is a multiple of 128
    tot_w = latent_dim + 6 + L
    out_w = _round_up(tot_w, 128)

    def row_spec(width):
        return pl.BlockSpec((tm, width), lambda i: (i, 0))

    def full_spec(a):                               # weights: constant block, fetched once
        return pl.BlockSpec(a.shape, lambda i: (0, 0))

    packed = pl.pallas_call(
        _fused_autoencoder_kernel,
        grid=(n_pad // tm,),
        in_specs=[row_spec(L)] + [full_spec(a) for a in weights],
        out_specs=row_spec(out_w),
        out_shape=jax.ShapeDtypeStruct((n_pad, out_w), jnp.float32),
        compiler_params=pltpu.CompilerParams(
            dimension_semantics=("parallel",),
            vmem_limit_bytes=32 * 1024 * 1024,
        ),
    )(x_flat, *weights)

    latent = packed[:N, :latent_dim]
    freq = packed[:N, latent_dim:latent_dim + 6]
    decoder = packed[:N, latent_dim + 6:latent_dim + 6 + L].reshape(N, 1, L)
    # TODO(synk): Trim() source not provided; assumed to crop the last axis to data_len
    # (identity for these shapes — deconv3 already produces exactly data_len samples).
    return latent, None, None, freq, decoder


# -----------------------------------------------------------------------------
# Parameter init (PyTorch weight conventions; Linear weights stored as (in, out))
# -----------------------------------------------------------------------------
def init_params(key, num_hiddens, kernel_size, data_len, latent_dim, regression_hidden):
    H, K = num_hiddens, kernel_size
    enc_flat = H * (data_len // 8)
    keys = jax.random.split(key, 40)
    kit = iter(keys)

    def nrm(shape, s=0.1):
        return (s * jax.random.normal(next(kit), shape)).astype(jnp.float32)

    def bn(c):
        return dict(gamma=1.0 + nrm((c,)), beta=nrm((c,)), mean=nrm((c,)),
                    var=jax.random.uniform(next(kit), (c,), minval=0.5,
                                           maxval=1.5).astype(jnp.float32))

    return {
        "conv1_w": nrm((H // 2, 1, K)), "bn1": bn(H // 2),
        "conv2_w": nrm((H, H // 2, K // 2)),
        "conv3_w": nrm((H, H, K // 4)), "bn3": bn(H),
        "enc_lin_w": nrm((enc_flat, latent_dim)), "enc_lin_b": nrm((latent_dim,)),
        "reg1_w": nrm((latent_dim, regression_hidden)), "reg1_b": nrm((regression_hidden,)),
        "reg2_w": nrm((regression_hidden, 6)), "reg2_b": nrm((6,)),
        "dec_lin_w": nrm((latent_dim, enc_flat)), "dec_lin_b": nrm((enc_flat,)),
        "deconv1_w": nrm((H, H, K // 4)), "bnd1": bn(H),
        "deconv2_w": nrm((H, H // 2, K // 2)), "bnd2": bn(H // 2),
        "deconv3_w": nrm((H // 2, 1, K)),
    }


# -----------------------------------------------------------------------------
# Pure-numpy reference of the PyTorch module (eval mode) for correctness check
# -----------------------------------------------------------------------------
def _ref_conv1d(x, w, stride, pad):
    N, Cin, L = x.shape
    Cout, _, K = w.shape
    Lo = (L + 2 * pad - K) // stride + 1
    xp = np.pad(x, ((0, 0), (0, 0), (pad, pad)))
    y = np.zeros((N, Cout, Lo), np.float32)
    for lo in range(Lo):
        y[:, :, lo] = np.einsum("nck,ock->no", xp[:, :, lo * stride: lo * stride + K], w)
    return y


def _ref_conv_transpose1d(x, w, stride, pad):
    N, Cin, L = x.shape
    _, Cout, K = w.shape
    Lo = (L - 1) * stride - 2 * pad + K
    full = np.zeros((N, Cout, (L - 1) * stride + K), np.float32)
    for li in range(L):
        full[:, :, li * stride: li * stride + K] += np.einsum("nc,cok->nok", x[:, :, li], w)
    return full[:, :, pad: pad + Lo]


def reference_forward(p, x, num_hiddens, kernel_size, data_len, eps=1e-5):
    H, K, L = num_hiddens, kernel_size, data_len
    x = np.asarray(x, np.float32)
    N = x.shape[0]
    leaky = lambda v: np.where(v >= 0, v, 0.01 * v)
    sigmoid = lambda v: 1.0 / (1.0 + np.exp(-v))
    w = lambda k: np.asarray(p[k], np.float32)

    def bn(v, d):
        g, b, m, var = (np.asarray(d[k], np.float32) for k in ("gamma", "beta", "mean", "var"))
        sc = g / np.sqrt(var + eps)
        return v * sc[None, :, None] + (b - m * sc)[None, :, None]

    h = leaky(bn(_ref_conv1d(x, w("conv1_w"), 2, K // 2 - 1), p["bn1"]))
    h = leaky(_ref_conv1d(h, w("conv2_w"), 2, K // 2 // 2 - 1))
    h = leaky(bn(_ref_conv1d(h, w("conv3_w"), 2, K // 4 // 2 - 1), p["bn3"]))
    latent = h.reshape(N, -1) @ w("enc_lin_w") + w("enc_lin_b")

    r = latent @ w("reg1_w") + w("reg1_b")
    freq = sigmoid(r @ w("reg2_w") + w("reg2_b"))

    d = (latent @ w("dec_lin_w") + w("dec_lin_b")).reshape(N, H, L // 8)
    d = leaky(bn(_ref_conv_transpose1d(d, w("deconv1_w"), 2, K // 4 // 2 - 1), p["bnd1"]))
    d = leaky(bn(_ref_conv_transpose1d(d, w("deconv2_w"), 2, K // 2 // 2 - 1), p["bnd2"]))
    d = leaky(_ref_conv_transpose1d(d, w("deconv3_w"), 2, K // 2 - 1))
    d = sigmoid(d[:, :, :L])                         # Trim (assumed crop) then Sigmoid
    return latent, freq, d


# -----------------------------------------------------------------------------
if __name__ == "__main__":
    num_hiddens, kernel_size, data_len = 32, 8, 64
    latent_dim, regression_hidden, dropout = 16, 32, 0.1   # dropout: identity at inference

    key = jax.random.PRNGKey(0)
    pkey, xkey = jax.random.split(key)
    params = init_params(pkey, num_hiddens, kernel_size, data_len,
                         latent_dim, regression_hidden)
    prep = prepare_weights(params, num_hiddens, kernel_size, data_len)

    # input: (batch=2, channels=1, length=data_len) -- PyTorch NCL
    x = jax.random.normal(xkey, (2, 1, data_len), dtype=jnp.float32)

    fwd = jax.jit(lambda inp: autoencoder_forward(prep, inp))
    enc, _, _, freq, dec = fwd(x)
    jax.block_until_ready((enc, freq, dec))

    assert enc.shape == (2, latent_dim)
    assert freq.shape == (2, 6)
    assert dec.shape == (2, 1, data_len)

    # numerical check vs a pure-numpy reference (bf16 matmul tolerance)
    ref_lat, ref_freq, ref_dec = reference_forward(params, x, num_hiddens,
                                                   kernel_size, data_len)
    np.testing.assert_allclose(np.asarray(enc), ref_lat, atol=5e-2, rtol=5e-2)
    np.testing.assert_allclose(np.asarray(freq), ref_freq, atol=5e-2, rtol=5e-2)
    np.testing.assert_allclose(np.asarray(dec), ref_dec, atol=5e-2, rtol=5e-2)

    print("KERNEL_OK")
</pallas_src>

<mosaic_0001>
module attributes {stable_mosaic.version = 11 : i64} {
  func.func @_fused_autoencoder_kernel(%arg0: i32, %arg1: memref<8x64xbf16, #tpu.memory_space<vmem>>, %arg2: memref<64x512xbf16, #tpu.memory_space<vmem>>, %arg3: memref<1x512xf32, #tpu.memory_space<vmem>>, %arg4: memref<512x512xbf16, #tpu.memory_space<vmem>>, %arg5: memref<512x256xbf16, #tpu.memory_space<vmem>>, %arg6: memref<1x256xf32, #tpu.memory_space<vmem>>, %arg7: memref<256x16xbf16, #tpu.memory_space<vmem>>, %arg8: memref<1x16xf32, #tpu.memory_space<vmem>>, %arg9: memref<256x6xbf16, #tpu.memory_space<vmem>>, %arg10: memref<1x6xf32, #tpu.memory_space<vmem>>, %arg11: memref<256x256xbf16, #tpu.memory_space<vmem>>, %arg12: memref<1x256xf32, #tpu.memory_space<vmem>>, %arg13: memref<256x512xbf16, #tpu.memory_space<vmem>>, %arg14: memref<1x512xf32, #tpu.memory_space<vmem>>, %arg15: memref<512x512xbf16, #tpu.memory_space<vmem>>, %arg16: memref<1x512xf32, #tpu.memory_space<vmem>>, %arg17: memref<512x64xbf16, #tpu.memory_space<vmem>>, %arg18: memref<8x128xf32, #tpu.memory_space<vmem>>) attributes {dimension_semantics = [#tpu.dimension_semantics<parallel>], iteration_bounds = array<i64: 1>, scalar_prefetch = 0 : i64, scratch_operands = 0 : i64, tpu.core_type = #tpu.core_type<tc>, window_params = [{transform_indices = @transform_0, window_bounds = array<i64: 8, 64>}, {pipeline_mode = #tpu.pipeline_mode<synchronous>, transform_indices = @transform_1, window_bounds = array<i64: 64, 512>}, {pipeline_mode = #tpu.pipeline_mode<synchronous>, transform_indices = @transform_2, window_bounds = array<i64: 1, 512>}, {pipeline_mode = #tpu.pipeline_mode<synchronous>, transform_indices = @transform_3, window_bounds = array<i64: 512, 512>}, {pipeline_mode = #tpu.pipeline_mode<synchronous>, transform_indices = @transform_4, window_bounds = array<i64: 512, 256>}, {pipeline_mode = #tpu.pipeline_mode<synchronous>, transform_indices = @transform_5, window_bounds = array<i64: 1, 256>}, {pipeline_mode = #tpu.pipeline_mode<synchronous>, transform_indices = @transform_6, window_bounds = array<i64: 256, 16>}, {pipeline_mode = #tpu.pipeline_mode<synchronous>, transform_indices = @transform_7, window_bounds = array<i64: 1, 16>}, {pipeline_mode = #tpu.pipeline_mode<synchronous>, transform_indices = @transform_8, window_bounds = array<i64: 256, 6>}, {pipeline_mode = #tpu.pipeline_mode<synchronous>, transform_indices = @transform_9, window_bounds = array<i64: 1, 6>}, {pipeline_mode = #tpu.pipeline_mode<synchronous>, transform_indices = @transform_10, window_bounds = array<i64: 256, 256>}, {pipeline_mode = #tpu.pipeline_mode<synchronous>, transform_indices = @transform_11, window_bounds = array<i64: 1, 256>}, {pipeline_mode = #tpu.pipeline_mode<synchronous>, transform_indices = @transform_12, window_bounds = array<i64: 256, 512>}, {pipeline_mode = #tpu.pipeline_mode<synchronous>, transform_indices = @transform_13, window_bounds = array<i64: 1, 512>}, {pipeline_mode = #tpu.pipeline_mode<synchronous>, transform_indices = @transform_14, window_bounds = array<i64: 512, 512>}, {pipeline_mode = #tpu.pipeline_mode<synchronous>, transform_indices = @transform_15, window_bounds = array<i64: 1, 512>}, {pipeline_mode = #tpu.pipeline_mode<synchronous>, transform_indices = @transform_16, window_bounds = array<i64: 512, 64>}, {transform_indices = @transform_17, window_bounds = array<i64: 8, 128>}]} {
    %c0 = arith.constant 0 : index
    %c0_0 = arith.constant 0 : index
    %0 = vector.load %arg1[%c0, %c0_0] : memref<8x64xbf16, #tpu.memory_space<vmem>>, vector<8x64xbf16>
    %c0_1 = arith.constant 0 : index
    %c0_2 = arith.constant 0 : index
    %1 = vector.load %arg2[%c0_1, %c0_2] : memref<64x512xbf16, #tpu.memory_space<vmem>>, vector<64x512xbf16>
    %cst = arith.constant dense<0.000000e+00> : vector<8x512xf32>
    %2 = tpu.matmul %0, %1, %cst {dimension_numbers = #tpu.dot_dimension_numbers<[1], [0], [0], [1], [0, 0, 1, 1], [], []>} : vector<8x64xbf16>, vector<64x512xbf16>, vector<8x512xf32> -> vector<8x512xf32>
    %c0_3 = arith.constant 0 : index
    %c0_4 = arith.constant 0 : index
    %3 = vector.load %arg3[%c0_3, %c0_4] : memref<1x512xf32, #tpu.memory_space<vmem>>, vector<1x512xf32>
    %4 = vector.broadcast %3 : vector<1x512xf32> to vector<8x512xf32>
    %5 = arith.addf %2, %4 : vector<8x512xf32>
    %cst_5 = arith.constant 0.000000e+00 : f32
    %6 = vector.broadcast %cst_5 : f32 to vector<8x512xf32>
    %7 = arith.cmpf oge, %5, %6 : vector<8x512xf32>
    %cst_6 = arith.constant 0.00999999977 : f32
    %8 = vector.broadcast %cst_6 : f32 to vector<8x512xf32>
    %9 = arith.mulf %8, %5 : vector<8x512xf32>
    %10 = arith.select %7, %5, %9 : vector<8x512xi1>, vector<8x512xf32>
    %11 = arith.truncf %10 : vector<8x512xf32> to vector<8x512xbf16>
    %c0_7 = arith.constant 0 : index
    %c0_8 = arith.constant 0 : index
    %12 = vector.load %arg4[%c0_7, %c0_8] : memref<512x512xbf16, #tpu.memory_space<vmem>>, vector<512x512xbf16>
    %cst_9 = arith.constant dense<0.000000e+00> : vector<8x512xf32>
    %13 = tpu.matmul %11, %12, %cst_9 {dimension_numbers = #tpu.dot_dimension_numbers<[1], [0], [0], [1], [0, 0, 1, 1], [], []>} : vector<8x512xbf16>, vector<512x512xbf16>, vector<8x512xf32> -> vector<8x512xf32>
    %cst_10 = arith.constant 0.000000e+00 : f32
    %14 = vector.broadcast %cst_10 : f32 to vector<8x512xf32>
    %15 = arith.cmpf oge, %13, %14 : vector<8x512xf32>
    %cst_11 = arith.constant 0.00999999977 : f32
    %16 = vector.broadcast %cst_11 : f32 to vector<8x512xf32>
    %17 = arith.mulf %16, %13 : vector<8x512xf32>
    %18 = arith.select %15, %13, %17 : vector<8x512xi1>, vector<8x512xf32>
    %19 = arith.truncf %18 : vector<8x512xf32> to vector<8x512xbf16>
    %c0_12 = arith.constant 0 : index
    %c0_13 = arith.constant 0 : index
    %20 = vector.load %arg5[%c0_12, %c0_13] : memref<512x256xbf16, #tpu.memory_space<vmem>>, vector<512x256xbf16>
    %cst_14 = arith.constant dense<0.000000e+00> : vector<8x256xf32>
    %21 = tpu.matmul %19, %20, %cst_14 {dimension_numbers = #tpu.dot_dimension_numbers<[1], [0], [0], [1], [0, 0, 1, 1], [], []>} : vector<8x512xbf16>, vector<512x256xbf16>, vector<8x256xf32> -> vector<8x256xf32>
    %c0_15 = arith.constant 0 : index
    %c0_16 = arith.constant 0 : index
    %22 = vector.load %arg6[%c0_15, %c0_16] : memref<1x256xf32, #tpu.memory_space<vmem>>, vector<1x256xf32>
    %23 = vector.broadcast %22 : vector<1x256xf32> to vector<8x256xf32>
    %24 = arith.addf %21, %23 : vector<8x256xf32>
    %cst_17 = arith.constant 0.000000e+00 : f32
    %25 = vector.broadcast %cst_17 : f32 to vector<8x256xf32>
    %26 = arith.cmpf oge, %24, %25 : vector<8x256xf32>
    %cst_18 = arith.constant 0.00999999977 : f32
    %27 = vector.broadcast %cst_18 : f32 to vector<8x256xf32>
    %28 = arith.mulf %27, %24 : vector<8x256xf32>
    %29 = arith.select %26, %24, %28 : vector<8x256xi1>, vector<8x256xf32>
    %30 = arith.truncf %29 : vector<8x256xf32> to vector<8x256xbf16>
    %c0_19 = arith.constant 0 : index
    %c0_20 = arith.constant 0 : index
    %31 = vector.load %arg7[%c0_19, %c0_20] : memref<256x16xbf16, #tpu.memory_space<vmem>>, vector<256x16xbf16>
    %cst_21 = arith.constant dense<0.000000e+00> : vector<8x16xf32>
    %32 = tpu.matmul %30, %31, %cst_21 {dimension_numbers = #tpu.dot_dimension_numbers<[1], [0], [0], [1], [0, 0, 1, 1], [], []>} : vector<8x256xbf16>, vector<256x16xbf16>, vector<8x16xf32> -> vector<8x16xf32>
    %c0_22 = arith.constant 0 : index
    %c0_23 = arith.constant 0 : index
    %33 = vector.load %arg8[%c0_22, %c0_23] : memref<1x16xf32, #tpu.memory_space<vmem>>, vector<1x16xf32>
    %34 = vector.broadcast %33 : vector<1x16xf32> to vector<8x16xf32>
    %35 = arith.addf %32, %34 : vector<8x16xf32>
    %36 = arith.truncf %29 : vector<8x256xf32> to vector<8x256xbf16>
    %c0_24 = arith.constant 0 : index
    %c0_25 = arith.constant 0 : index
    %37 = vector.load %arg9[%c0_24, %c0_25] : memref<256x6xbf16, #tpu.memory_space<vmem>>, vector<256x6xbf16>
    %cst_26 = arith.constant dense<0.000000e+00> : vector<8x6xf32>
    %38 = tpu.matmul %36, %37, %cst_26 {dimension_numbers = #tpu.dot_dimension_numbers<[1], [0], [0], [1], [0, 0, 1, 1], [], []>} : vector<8x256xbf16>, vector<256x6xbf16>, vector<8x6xf32> -> vector<8x6xf32>
    %c0_27 = arith.constant 0 : index
    %c0_28 = arith.constant 0 : index
    %39 = vector.load %arg10[%c0_27, %c0_28] : memref<1x6xf32, #tpu.memory_space<vmem>>, vector<1x6xf32>
    %40 = vector.broadcast %39 : vector<1x6xf32> to vector<8x6xf32>
    %41 = arith.addf %38, %40 : vector<8x6xf32>
    %42 = arith.negf %41 : vector<8x6xf32>
    %43 = math.exp %42 : vector<8x6xf32>
    %cst_29 = arith.constant 1.000000e+00 : f32
    %44 = vector.broadcast %cst_29 : f32 to vector<8x6xf32>
    %45 = arith.addf %44, %43 : vector<8x6xf32>
    %46 = arith.divf %44, %45 : vector<8x6xf32>
    %47 = arith.truncf %29 : vector<8x256xf32> to vector<8x256xbf16>
    %c0_30 = arith.constant 0 : index
    %c0_31 = arith.constant 0 : index
    %48 = vector.load %arg11[%c0_30, %c0_31] : memref<256x256xbf16, #tpu.memory_space<vmem>>, vector<256x256xbf16>
    %cst_32 = arith.constant dense<0.000000e+00> : vector<8x256xf32>
    %49 = tpu.matmul %47, %48, %cst_32 {dimension_numbers = #tpu.dot_dimension_numbers<[1], [0], [0], [1], [0, 0, 1, 1], [], []>} : vector<8x256xbf16>, vector<256x256xbf16>, vector<8x256xf32> -> vector<8x256xf32>
    %c0_33 = arith.constant 0 : index
    %c0_34 = arith.constant 0 : index
    %50 = vector.load %arg12[%c0_33, %c0_34] : memref<1x256xf32, #tpu.memory_space<vmem>>, vector<1x256xf32>
    %51 = vector.broadcast %50 : vector<1x256xf32> to vector<8x256xf32>
    %52 = arith.addf %49, %51 : vector<8x256xf32>
    %53 = arith.truncf %52 : vector<8x256xf32> to vector<8x256xbf16>
    %c0_35 = arith.constant 0 : index
    %c0_36 = arith.constant 0 : index
    %54 = vector.load %arg13[%c0_35, %c0_36] : memref<256x512xbf16, #tpu.memory_space<vmem>>, vector<256x512xbf16>
    %cst_37 = arith.constant dense<0.000000e+00> : vector<8x512xf32>
    %55 = tpu.matmul %53, %54, %cst_37 {dimension_numbers = #tpu.dot_dimension_numbers<[1], [0], [0], [1], [0, 0, 1, 1], [], []>} : vector<8x256xbf16>, vector<256x512xbf16>, vector<8x512xf32> -> vector<8x512xf32>
    %c0_38 = arith.constant 0 : index
    %c0_39 = arith.constant 0 : index
    %56 = vector.load %arg14[%c0_38, %c0_39] : memref<1x512xf32, #tpu.memory_space<vmem>>, vector<1x512xf32>
    %57 = vector.broadcast %56 : vector<1x512xf32> to vector<8x512xf32>
    %58 = arith.addf %55, %57 : vector<8x512xf32>
    %cst_40 = arith.constant 0.000000e+00 : f32
    %59 = vector.broadcast %cst_40 : f32 to vector<8x512xf32>
    %60 = arith.cmpf oge, %58, %59 : vector<8x512xf32>
    %cst_41 = arith.constant 0.00999999977 : f32
    %61 = vector.broadcast %cst_41 : f32 to vector<8x512xf32>
    %62 = arith.mulf %61, %58 : vector<8x512xf32>
    %63 = arith.select %60, %58, %62 : vector<8x512xi1>, vector<8x512xf32>
    %64 = arith.truncf %63 : vector<8x512xf32> to vector<8x512xbf16>
    %c0_42 = arith.constant 0 : index
    %c0_43 = arith.constant 0 : index
    %65 = vector.load %arg15[%c0_42, %c0_43] : memref<512x512xbf16, #tpu.memory_space<vmem>>, vector<512x512xbf16>
    %cst_44 = arith.constant dense<0.000000e+00> : vector<8x512xf32>
    %66 = tpu.matmul %64, %65, %cst_44 {dimension_numbers = #tpu.dot_dimension_numbers<[1], [0], [0], [1], [0, 0, 1, 1], [], []>} : vector<8x512xbf16>, vector<512x512xbf16>, vector<8x512xf32> -> vector<8x512xf32>
    %c0_45 = arith.constant 0 : index
    %c0_46 = arith.constant 0 : index
    %67 = vector.load %arg16[%c0_45, %c0_46] : memref<1x512xf32, #tpu.memory_space<vmem>>, vector<1x512xf32>
    %68 = vector.broadcast %67 : vector<1x512xf32> to vector<8x512xf32>
    %69 = arith.addf %66, %68 : vector<8x512xf32>
    %cst_47 = arith.constant 0.000000e+00 : f32
    %70 = vector.broadcast %cst_47 : f32 to vector<8x512xf32>
    %71 = arith.cmpf oge, %69, %70 : vector<8x512xf32>
    %cst_48 = arith.constant 0.00999999977 : f32
    %72 = vector.broadcast %cst_48 : f32 to vector<8x512xf32>
    %73 = arith.mulf %72, %69 : vector<8x512xf32>
    %74 = arith.select %71, %69, %73 : vector<8x512xi1>, vector<8x512xf32>
    %75 = arith.truncf %74 : vector<8x512xf32> to vector<8x512xbf16>
    %c0_49 = arith.constant 0 : index
    %c0_50 = arith.constant 0 : index
    %76 = vector.load %arg17[%c0_49, %c0_50] : memref<512x64xbf16, #tpu.memory_space<vmem>>, vector<512x64xbf16>
    %cst_51 = arith.constant dense<0.000000e+00> : vector<8x64xf32>
    %77 = tpu.matmul %75, %76, %cst_51 {dimension_numbers = #tpu.dot_dimension_numbers<[1], [0], [0], [1], [0, 0, 1, 1], [], []>} : vector<8x512xbf16>, vector<512x64xbf16>, vector<8x64xf32> -> vector<8x64xf32>
    %cst_52 = arith.constant 0.000000e+00 : f32
    %78 = vector.broadcast %cst_52 : f32 to vector<8x64xf32>
    %79 = arith.cmpf oge, %77, %78 : vector<8x64xf32>
    %cst_53 = arith.constant 0.00999999977 : f32
    %80 = vector.broadcast %cst_53 : f32 to vector<8x64xf32>
    %81 = arith.mulf %80, %77 : vector<8x64xf32>
    %82 = arith.select %79, %77, %81 : vector<8x64xi1>, vector<8x64xf32>
    %83 = arith.negf %82 : vector<8x64xf32>
    %84 = math.exp %83 : vector<8x64xf32>
    %cst_54 = arith.constant 1.000000e+00 : f32
    %85 = vector.broadcast %cst_54 : f32 to vector<8x64xf32>
    %86 = arith.addf %85, %84 : vector<8x64xf32>
    %87 = arith.divf %85, %86 : vector<8x64xf32>
    %c0_55 = arith.constant 0 : index
    %c0_56 = arith.constant 0 : index
    %88 = vector.load %arg18[%c0_55, %c0_56] : memref<8x128xf32, #tpu.memory_space<vmem>>, vector<8x16xf32>
    tpu.vector_store %arg18[%c0_55, %c0_56], %35 {strides = array<i32>} : memref<8x128xf32, #tpu.memory_space<vmem>>, vector<8x16xf32>,
    %c0_57 = arith.constant 0 : index
    %c16 = arith.constant 16 : index
    %89 = vector.load %arg18[%c0_57, %c16] : memref<8x128xf32, #tpu.memory_space<vmem>>, vector<8x6xf32>
    tpu.vector_store %arg18[%c0_57, %c16], %46 {strides = array<i32>} : memref<8x128xf32, #tpu.memory_space<vmem>>, vector<8x6xf32>,
    %c0_58 = arith.constant 0 : index
    %c22 = arith.constant 22 : index
    %90 = vector.load %arg18[%c0_58, %c22] : memref<8x128xf32, #tpu.memory_space<vmem>>, vector<8x64xf32>
    tpu.vector_store %arg18[%c0_58, %c22], %87 {strides = array<i32>} : memref<8x128xf32, #tpu.memory_space<vmem>>, vector<8x64xf32>,
    %cst_59 = arith.constant 0.000000e+00 : f32
    %91 = vector.broadcast %cst_59 : f32 to vector<8x42xf32>
    %c0_60 = arith.constant 0 : index
    %c86 = arith.constant 86 : index
    %92 = vector.load %arg18[%c0_60, %c86] : memref<8x128xf32, #tpu.memory_space<vmem>>, vector<8x42xf32>
    tpu.vector_store %arg18[%c0_60, %c86], %91 {strides = array<i32>} : memref<8x128xf32, #tpu.memory_space<vmem>>, vector<8x42xf32>,
    return
  }
  func.func @transform_0(%arg0: i32) -> (i32, i32) {
    %c0_i32 = arith.constant 0 : i32
    %c0_i32_0 = arith.constant 0 : i32
    return %arg0, %c0_i32 : i32, i32
  }
  func.func @transform_1(%arg0: i32) -> (i32, i32) {
    %c0_i32 = arith.constant 0 : i32
    %c0_i32_0 = arith.constant 0 : i32
    %c0_i32_1 = arith.constant 0 : i32
    return %c0_i32, %c0_i32_0 : i32, i32
  }
  func.func @transform_2(%arg0: i32) -> (i32, i32) {
    %c0_i32 = arith.constant 0 : i32
    %c0_i32_0 = arith.constant 0 : i32
    %c0_i32_1 = arith.constant 0 : i32
    return %c0_i32, %c0_i32_0 : i32, i32
  }
  func.func @transform_3(%arg0: i32) -> (i32, i32) {
    %c0_i32 = arith.constant 0 : i32
    %c0_i32_0 = arith.constant 0 : i32
    %c0_i32_1 = arith.constant 0 : i32
    return %c0_i32, %c0_i32_0 : i32, i32
  }
  func.func @transform_4(%arg0: i32) -> (i32, i32) {
    %c0_i32 = arith.constant 0 : i32
    %c0_i32_0 = arith.constant 0 : i32
    %c0_i32_1 = arith.constant 0 : i32
    return %c0_i32, %c0_i32_0 : i32, i32
  }
  func.func @transform_5(%arg0: i32) -> (i32, i32) {
    %c0_i32 = arith.constant 0 : i32
    %c0_i32_0 = arith.constant 0 : i32
    %c0_i32_1 = arith.constant 0 : i32
    return %c0_i32, %c0_i32_0 : i32, i32
  }
  func.func @transform_6(%arg0: i32) -> (i32, i32) {
    %c0_i32 = arith.constant 0 : i32
    %c0_i32_0 = arith.constant 0 : i32
    %c0_i32_1 = arith.constant 0 : i32
    return %c0_i32, %c0_i32_0 : i32, i32
  }
  func.func @transform_7(%arg0: i32) -> (i32, i32) {
    %c0_i32 = arith.constant 0 : i32
    %c0_i32_0 = arith.constant 0 : i32
    %c0_i32_1 = arith.constant 0 : i32
    return %c0_i32, %c0_i32_0 : i32, i32
  }
  func.func @transform_8(%arg0: i32) -> (i32, i32) {
    %c0_i32 = arith.constant 0 : i32
    %c0_i32_0 = arith.constant 0 : i32
    %c0_i32_1 = arith.constant 0 : i32
    return %c0_i32, %c0_i32_0 : i32, i32
  }
  func.func @transform_9(%arg0: i32) -> (i32, i32) {
    %c0_i32 = arith.constant 0 : i32
    %c0_i32_0 = arith.constant 0 : i32
    %c0_i32_1 = arith.constant 0 : i32
    return %c0_i32, %c0_i32_0 : i32, i32
  }
  func.func @transform_10(%arg0: i32) -> (i32, i32) {
    %c0_i32 = arith.constant 0 : i32
    %c0_i32_0 = arith.constant 0 : i32
    %c0_i32_1 = arith.constant 0 : i32
    return %c0_i32, %c0_i32_0 : i32, i32
  }
  func.func @transform_11(%arg0: i32) -> (i32, i32) {
    %c0_i32 = arith.constant 0 : i32
    %c0_i32_0 = arith.constant 0 : i32
    %c0_i32_1 = arith.constant 0 : i32
    return %c0_i32, %c0_i32_0 : i32, i32
  }
  func.func @transform_12(%arg0: i32) -> (i32, i32) {
    %c0_i32 = arith.constant 0 : i32
    %c0_i32_0 = arith.constant 0 : i32
    %c0_i32_1 = arith.constant 0 : i32
    return %c0_i32, %c0_i32_0 : i32, i32
  }
  func.func @transform_13(%arg0: i32) -> (i32, i32) {
    %c0_i32 = arith.constant 0 : i32
    %c0_i32_0 = arith.constant 0 : i32
    %c0_i32_1 = arith.constant 0 : i32
    return %c0_i32, %c0_i32_0 : i32, i32
  }
  func.func @transform_14(%arg0: i32) -> (i32, i32) {
    %c0_i32 = arith.constant 0 : i32
    %c0_i32_0 = arith.constant 0 : i32
    %c0_i32_1 = arith.constant 0 : i32
    return %c0_i32, %c0_i32_0 : i32, i32
  }
  func.func @transform_15(%arg0: i32) -> (i32, i32) {
    %c0_i32 = arith.constant 0 : i32
    %c0_i32_0 = arith.constant 0 : i32
    %c0_i32_1 = arith.constant 0 : i32
    return %c0_i32, %c0_i32_0 : i32, i32
  }
  func.func @transform_16(%arg0: i32) -> (i32, i32) {
    %c0_i32 = arith.constant 0 : i32
    %c0_i32_0 = arith.constant 0 : i32
    %c0_i32_1 = arith.constant 0 : i32
    return %c0_i32, %c0_i32_0 : i32, i32
  }
  func.func @transform_17(%arg0: i32) -> (i32, i32) {
    %c0_i32 = arith.constant 0 : i32
    %c0_i32_0 = arith.constant 0 : i32
    return %arg0, %c0_i32 : i32, i32
  }
}

</mosaic_0001>

<bundles_post_ra>
// kernel: _lambda_.1
= control target key start
LH: loop header
LB: loop body
LE: loop exit
PB: predicated region body
PF: predicated region fallthrough
CT: control target
= control target key end

     0   :  { %v5494_v1 = vmov 0   ;;  %vm176_vm0 = vcmask 523264   ;;  %vm4134_vm11 = vcmask 130048   ;;  %vm4140_vm12 = vcmask 179328   ;;  %s7172_s1 = inlined_call_operand.vmem [shape: bf16[64,512], index: 1, kind: input, shape index: {}]   ;;  %s7173_s3 = inlined_call_operand.vmem [shape: bf16[512,512], index: 3, kind: input, shape index: {}]   ;;  %s7174_s0 = inlined_call_operand.vmem [shape: bf16[8,64], index: 0, kind: input, shape index: {}]   ;;  %s7175_s4 = inlined_call_operand.vmem [shape: bf16[512,256], index: 4, kind: input, shape index: {}]   ;;  %s7176_s2 = inlined_call_operand.vmem [shape: f32[1,512], index: 2, kind: input, shape index: {}]   ;;  %s7177_s6 = inlined_call_operand.vmem [shape: bf16[256,16], index: 6, kind: input, shape index: {}]   ;;  %s7178_s8 = inlined_call_operand.vmem [shape: bf16[256,6], index: 8, kind: input, shape index: {}]   ;;  %s7179_s10 = inlined_call_operand.vmem [shape: bf16[256,256], index: 10, kind: input, shape index: {}]   ;;  %s7180_s5 = inlined_call_operand.vmem [shape: f32[1,256], index: 5, kind: input, shape index: {}]   ;;  %s7181_s12 = inlined_call_operand.vmem [shape: bf16[256,512], index: 12, kind: input, shape index: {}]   ;;  %s7182_s7 = inlined_call_operand.vmem [shape: f32[1,16], index: 7, kind: input, shape index: {}]   ;;  %s7183_s17 = inlined_call_operand.vmem [shape: f32[8,128], index: 17, kind: output, shape index: {}]   ;;  %s7184_s9 = inlined_call_operand.vmem [shape: f32[1,6], index: 9, kind: input, shape index: {}]   ;;  %s7185_s14 = inlined_call_operand.vmem [shape: bf16[512,512], index: 14, kind: input, shape index: {}]   ;;  %s7186_s11 = inlined_call_operand.vmem [shape: f32[1,256], index: 11, kind: input, shape index: {}]   ;;  %s7187_s16 = inlined_call_operand.vmem [shape: bf16[512,64], index: 16, kind: input, shape index: {}]   ;;  %s7188_s13 = inlined_call_operand.vmem [shape: f32[1,512], index: 13, kind: input, shape index: {}]   ;;  %s7189_s15 = inlined_call_operand.vmem [shape: f32[1,512], index: 15, kind: input, shape index: {}]  }
   0x1   :  { %7192 = sst [smem:[#allocation2_spill]] %s7172_s1  ;;  %212 = vmatprep.mubr.bf16.mxu0 %v5494_v1  ;;  %253 = vmatprep.mubr.bf16.mxu1 %v5494_v1  ;;  %v57_v16 = vld [vmem:[%s7174_s0] sm:$0xf] }
   0x2   :  { %7193 = sst [smem:[#allocation3_spill]] %s7173_s3  ;;  %s7194_s26 = sld [smem:[#allocation2_spill]] }
   0x3   :  { %s7195_s24 = sld [smem:[#allocation3_spill]] }
   0x8   :  { %v4774_v0 = vld [vmem:[%s7194_s26 + $0x4] ss:$16 sps:$4 sm:$0xff]   ;;  %v4776_v2 = vld [vmem:[%s7194_s26] ss:$16 sps:$4 sm:$0xff]   ;;  %v4786_v7 = vld [vmem:[%s7194_s26 + $0xc] ss:$16 sps:$4 sm:$0xff]  }
   0x9   :  { %180 = vmatprep.subr.bf16.mxu0 %v4774_v0  ;;  %v4777_v3 = vld [vmem:[%s7194_s26 + $0x24] ss:$16 sps:$4 sm:$0xff]   ;;  %v4779_v4 = vld [vmem:[%s7194_s26 + $0x20] ss:$16 sps:$4 sm:$0xff]   ;;  %v4788_v8 = vld [vmem:[%s7194_s26 + $0x8] ss:$16 sps:$4 sm:$0xff]   ;;  %221 = vmatprep.subr.bf16.mxu1 %v4786_v7 }
   0xa   :  { %181 = vmatpush1.bf16.msra.mxu0 %v4776_v2  ;;  %v4780_v5 = vld [vmem:[%s7194_s26 + $0x44] ss:$16 sps:$4 sm:$0xff]   ;;  %v4782_v6 = vld [vmem:[%s7194_s26 + $0x40] ss:$16 sps:$4 sm:$0xff]   ;;  %v4789_v9 = vld [vmem:[%s7194_s26 + $0x2c] ss:$16 sps:$4 sm:$0xff]   ;;  %222 = vmatpush1.bf16.msra.mxu1 %v4788_v8 }
   0xb   :  { %182 = vmatprep.subr.bf16.mxu0 %v4777_v3  ;;  %v4783_v10 = vld [vmem:[%s7194_s26 + $0x64] ss:$16 sps:$4 sm:$0xff]   ;;  %v4791_v11 = vld [vmem:[%s7194_s26 + $0x28] ss:$16 sps:$4 sm:$0xff]   ;;  %223 = vmatprep.subr.bf16.mxu1 %v4789_v9  ;;  %v4792_v12 = vld [vmem:[%s7194_s26 + $0x4c] ss:$16 sps:$4 sm:$0xff]  }
   0xc   :  { %v4785_v13 = vld [vmem:[%s7194_s26 + $0x60] ss:$16 sps:$4 sm:$0xff]   ;;  %v4800_v14 = vld [vmem:[%s7195_s24 + $0x4] ss:$16 sps:$4 sm:$0xff]   ;;  %v4794_v15 = vld [vmem:[%s7194_s26 + $0x48] ss:$16 sps:$4 sm:$0xff]  }
   0xd   :  { %v4795_v17 = vld [vmem:[%s7194_s26 + $0x6c] ss:$16 sps:$4 sm:$0xff]   ;;  %v4798_v18 = vld [vmem:[%s7195_s24] ss:$16 sps:$4 sm:$0xff]   ;;  %v4806_v19 = vld [vmem:[%s7195_s24 + $0x24] ss:$16 sps:$4 sm:$0xff]  }
   0xe   :  { %183 = vmatpush1.bf16.msra.mxu0 %v4779_v4  ;;  %224 = vmatpush1.bf16.msra.mxu1 %v4791_v11  ;;  %v4797_v20 = vld [vmem:[%s7194_s26 + $0x68] ss:$16 sps:$4 sm:$0xff]   ;;  %v4803_v21 = vld [vmem:[%s7195_s24 + $0xc] ss:$16 sps:$4 sm:$0xff]   ;;  %v4804_v22 = vld [vmem:[%s7195_s24 + $0x20] ss:$16 sps:$4 sm:$0xff]  }
   0xf   :  { %184 = vmatprep.subr.bf16.mxu0 %v4780_v5  ;;  %225 = vmatprep.subr.bf16.mxu1 %v4792_v12  ;;  %v4812_v23 = vld [vmem:[%s7195_s24 + $0x44] ss:$16 sps:$4 sm:$0xff]   ;;  %v4801_v24 = vld [vmem:[%s7195_s24 + $0x8] ss:$16 sps:$4 sm:$0xff]   ;;  %v4809_v25 = vld [vmem:[%s7195_s24 + $0x2c] ss:$16 sps:$4 sm:$0xff]  }
  0x10   :  { %v4810_v26 = vld [vmem:[%s7195_s24 + $0x40] ss:$16 sps:$4 sm:$0xff]   ;;  %v4818_v27 = vld [vmem:[%s7195_s24 + $0x64] ss:$16 sps:$4 sm:$0xff]   ;;  %v4807_v28 = vld [vmem:[%s7195_s24 + $0x28] ss:$16 sps:$4 sm:$0xff]  }
  0x11   :  { %v4815_v29 = vld [vmem:[%s7195_s24 + $0x4c] ss:$16 sps:$4 sm:$0xff]   ;;  %v4816_v30 = vld [vmem:[%s7195_s24 + $0x60] ss:$16 sps:$4 sm:$0xff]   ;;  %v4824_v31 = vld [vmem:[%s7195_s24 + $0x84] ss:$16 sps:$4 sm:$0xff]  }
  0x12   :  { %185 = vmatpush1.bf16.msra.mxu0 %v4782_v6  ;;  %226 = vmatpush1.bf16.msra.mxu1 %v4794_v15  ;;  %v4813_v32 = vld [vmem:[%s7195_s24 + $0x48] ss:$16 sps:$4 sm:$0xff]   ;;  %v4821_v33 = vld [vmem:[%s7195_s24 + $0x6c] ss:$16 sps:$4 sm:$0xff]   ;;  %v4822_v34 = vld [vmem:[%s7195_s24 + $0x80] ss:$16 sps:$4 sm:$0xff]  }
  0x13   :  { %186 = vmatprep.subr.bf16.mxu0 %v4783_v10  ;;  %227 = vmatprep.subr.bf16.mxu1 %v4795_v17  ;;  %v4830_v35 = vld [vmem:[%s7195_s24 + $0xa4] ss:$16 sps:$4 sm:$0xff]   ;;  %v4819_v36 = vld [vmem:[%s7195_s24 + $0x68] ss:$16 sps:$4 sm:$0xff]   ;;  %v4827_v37 = vld [vmem:[%s7195_s24 + $0x8c] ss:$16 sps:$4 sm:$0xff]  }
  0x14   :  { %v4828_v38 = vld [vmem:[%s7195_s24 + $0xa0] ss:$16 sps:$4 sm:$0xff]   ;;  %v4836_v39 = vld [vmem:[%s7195_s24 + $0xc4] ss:$16 sps:$4 sm:$0xff]   ;;  %v4825_v40 = vld [vmem:[%s7195_s24 + $0x88] ss:$16 sps:$4 sm:$0xff]  }
  0x15   :  { %v4833_v41 = vld [vmem:[%s7195_s24 + $0xac] ss:$16 sps:$4 sm:$0xff]   ;;  %v4834_v42 = vld [vmem:[%s7195_s24 + $0xc0] ss:$16 sps:$4 sm:$0xff]   ;;  %v4842_v43 = vld [vmem:[%s7195_s24 + $0xe4] ss:$16 sps:$4 sm:$0xff]  }
  0x16   :  { %187 = vmatpush1.bf16.msra.mxu0 %v4785_v13  ;;  %228 = vmatpush1.bf16.msra.mxu1 %v4797_v20  ;;  %v4831_v44 = vld [vmem:[%s7195_s24 + $0xa8] ss:$16 sps:$4 sm:$0xff]   ;;  %v4839_v45 = vld [vmem:[%s7195_s24 + $0xcc] ss:$16 sps:$4 sm:$0xff]   ;;  %v4840_v46 = vld [vmem:[%s7195_s24 + $0xe0] ss:$16 sps:$4 sm:$0xff]   ;;  %v76_v20 = vlaneseq }
  0x17   :  { %1046 = vmatprep.subr.bf16.mxu0 %v4800_v14  ;;  %1128 = vmatprep.subr.bf16.mxu1 %v4803_v21  ;;  %v4848_v47 = vld [vmem:[%s7195_s24 + $0x104] ss:$16 sps:$4 sm:$0xff]   ;;  %v4837_v48 = vld [vmem:[%s7195_s24 + $0xc8] ss:$16 sps:$4 sm:$0xff]   ;;  %v4845_v49 = vld [vmem:[%s7195_s24 + $0xec] ss:$16 sps:$4 sm:$0xff]  }
  0x18   :  { %v4843_v50 = vld [vmem:[%s7195_s24 + $0xe8] ss:$16 sps:$4 sm:$0xff]   ;;  %v4846_v51 = vld [vmem:[%s7195_s24 + $0x100] ss:$16 sps:$4 sm:$0xff]   ;;  %v4851_v52 = vld [vmem:[%s7195_s24 + $0x10c] ss:$16 sps:$4 sm:$0xff]  }
  0x19   :  { %4170 = vmatmul.mubr.msk.bf16.vlgmr.msra.gmra.mrb[0].mxu0 %vm176_vm0, %v57_v16  ;;  %4171 = vmatmul.mubr.msk.bf16.vlgmr.msra.gmra.mrb[0].mxu1 %vm176_vm0, %v57_v16  ;;  %v4854_v53 = vld [vmem:[%s7195_s24 + $0x124] ss:$16 sps:$4 sm:$0xff]   ;;  %v4852_v54 = vld [vmem:[%s7195_s24 + $0x120] ss:$16 sps:$4 sm:$0xff]   ;;  %v4849_v56 = vld [vmem:[%s7195_s24 + $0x108] ss:$16 sps:$4 sm:$0xff]  }
  0x1a   :  { %1047 = vmatpush1.bf16.msra.mxu0 %v4798_v18  ;;  %1129 = vmatpush1.bf16.msra.mxu1 %v4801_v24  ;;  %v4860_v55 = vld [vmem:[%s7195_s24 + $0x144] ss:$16 sps:$4 sm:$0xff]   ;;  %v4857_v57 = vld [vmem:[%s7195_s24 + $0x12c] ss:$16 sps:$4 sm:$0xff]   ;;  %v4858_v58 = vld [vmem:[%s7195_s24 + $0x140] ss:$16 sps:$4 sm:$0xff]  }
  0x1b   :  { %1048 = vmatprep.subr.bf16.mxu0 %v4806_v19  ;;  %1130 = vmatprep.subr.bf16.mxu1 %v4809_v25  ;;  %v4866_v59 = vld [vmem:[%s7195_s24 + $0x164] ss:$16 sps:$4 sm:$0xff]   ;;  %v4855_v60 = vld [vmem:[%s7195_s24 + $0x128] ss:$16 sps:$4 sm:$0xff]   ;;  %v4863_v61 = vld [vmem:[%s7195_s24 + $0x14c] ss:$16 sps:$4 sm:$0xff]  }
  0x1c   :  { %v4864_v62 = vld [vmem:[%s7195_s24 + $0x160] ss:$16 sps:$4 sm:$0xff]   ;;  %v4872_v63 = vld [vmem:[%s7195_s24 + $0x184] ss:$16 sps:$4 sm:$0xff]   ;;  %v4861_v0 = vld [vmem:[%s7195_s24 + $0x148] ss:$16 sps:$4 sm:$0xff]  }
  0x1d   :  { %v4869_v1 = vld [vmem:[%s7195_s24 + $0x16c] ss:$16 sps:$4 sm:$0xff]   ;;  %v4870_v2 = vld [vmem:[%s7195_s24 + $0x180] ss:$16 sps:$4 sm:$0xff]   ;;  %v4878_v3 = vld [vmem:[%s7195_s24 + $0x1a4] ss:$16 sps:$4 sm:$0xff]  }
  0x1e   :  { %1049 = vmatpush1.bf16.msra.mxu0 %v4804_v22  ;;  %1131 = vmatpush1.bf16.msra.mxu1 %v4807_v28  ;;  %v4867_v4 = vld [vmem:[%s7195_s24 + $0x168] ss:$16 sps:$4 sm:$0xff]   ;;  %v4875_v5 = vld [vmem:[%s7195_s24 + $0x18c] ss:$16 sps:$4 sm:$0xff]   ;;  %v4876_v6 = vld [vmem:[%s7195_s24 + $0x1a0] ss:$16 sps:$4 sm:$0xff]  }
  0x1f   :  { %1050 = vmatprep.subr.bf16.mxu0 %v4812_v23  ;;  %1132 = vmatprep.subr.bf16.mxu1 %v4815_v29  ;;  %v4873_v7 = vld [vmem:[%s7195_s24 + $0x188] ss:$16 sps:$4 sm:$0xff]   ;;  %v4881_v8 = vld [vmem:[%s7195_s24 + $0x1ac] ss:$16 sps:$4 sm:$0xff]   ;;  %v4884_v10 = vld [vmem:[%s7195_s24 + $0x1c4] ss:$16 sps:$4 sm:$0xff]  }
  0x20   :  { %v4879_v9 = vld [vmem:[%s7195_s24 + $0x1a8] ss:$16 sps:$4 sm:$0xff]   ;;  %v4887_v11 = vld [vmem:[%s7195_s24 + $0x1cc] ss:$16 sps:$4 sm:$0xff]   ;;  %v4882_v12 = vld [vmem:[%s7195_s24 + $0x1c0] ss:$16 sps:$4 sm:$0xff]  }
  0x21   :  { %v4885_v13 = vld [vmem:[%s7195_s24 + $0x1c8] ss:$16 sps:$4 sm:$0xff]   ;;  %v4890_v14 = vld [vmem:[%s7195_s24 + $0x1e4] ss:$16 sps:$4 sm:$0xff]   ;;  %v4893_v15 = vld [vmem:[%s7195_s24 + $0x1ec] ss:$16 sps:$4 sm:$0xff]  }
  0x22   :  { %1051 = vmatpush1.bf16.msra.mxu0 %v4810_v26  ;;  %1133 = vmatpush1.bf16.msra.mxu1 %v4813_v32  ;;  %v4888_v16 = vld [vmem:[%s7195_s24 + $0x1e0] ss:$16 sps:$4 sm:$0xff]   ;;  %v4891_v17 = vld [vmem:[%s7195_s24 + $0x1e8] ss:$16 sps:$4 sm:$0xff]   ;;  %v4896_v18 = vld [vmem:[%s7195_s24 + $0x204] ss:$16 sps:$4 sm:$0xff]  }
  0x23   :  { %1052 = vmatprep.subr.bf16.mxu0 %v4818_v27  ;;  %1134 = vmatprep.subr.bf16.mxu1 %v4821_v33  ;;  %v4899_v19 = vld [vmem:[%s7195_s24 + $0x20c] ss:$16 sps:$4 sm:$0xff]   ;;  %v5839_v21 = vshrl.u32 %v76_v20, 7  ;;  %v5847_v23 = vld [vmem:[%s7176_s2] sm:$0xf] }
  0x24   :  { %v4953_v20 = vld [vmem:[%s7195_s24 + $0x32c] ss:$16 sps:$4 sm:$0xff]  }
  0x25   :  { %v5842_v22 = vsub.s32 0, %v5839_v21  ;;  %v5850_v24 = vsub.s32 1, %v5839_v21  ;;  %v5857_v28 = vsub.s32 3, %v5839_v21 }
  0x26   :  { %1053 = vmatpush1.bf16.msra.mxu0 %v4816_v30  ;;  %1135 = vmatpush1.bf16.msra.mxu1 %v4819_v36 }
  0x27   :  { %1054 = vmatprep.subr.bf16.mxu0 %v4824_v31  ;;  %1136 = vmatprep.subr.bf16.mxu1 %v4827_v37  ;;  %v79_v25 = vrot.slane %v5847_v23, %v5842_v22  ;;  %v83_v26 = vrot.slane %v5847_v23, %v5850_v24  ;;  %v91_v36 = vrot.slane %v5847_v23, %v5857_v28 }
  0x2a   :  { %1055 = vmatpush1.bf16.msra.mxu0 %v4822_v34  ;;  %1137 = vmatpush1.bf16.msra.mxu1 %v4825_v40 }
  0x2b   :  { %1056 = vmatprep.subr.bf16.mxu0 %v4830_v35  ;;  %1138 = vmatprep.subr.bf16.mxu1 %v4833_v41  ;;  %v4894_v41 = vld [vmem:[%s7195_s24 + $0x200] ss:$16 sps:$4 sm:$0xff]  }
  0x2e   :  { %1057 = vmatpush1.bf16.msra.mxu0 %v4828_v38  ;;  %1139 = vmatpush1.bf16.msra.mxu1 %v4831_v44 }
  0x2f   :  { %1058 = vmatprep.subr.bf16.mxu0 %v4836_v39  ;;  %1140 = vmatprep.subr.bf16.mxu1 %v4839_v45  ;;  %v4902_v45 = vld [vmem:[%s7195_s24 + $0x224] ss:$16 sps:$4 sm:$0xff]  }
  0x32   :  { %1059 = vmatpush1.bf16.msra.mxu0 %v4834_v42  ;;  %1141 = vmatpush1.bf16.msra.mxu1 %v4837_v48  ;;  %v4897_v42 = vld [vmem:[%s7195_s24 + $0x208] ss:$16 sps:$4 sm:$0xff]  }
  0x33   :  { %1060 = vmatprep.subr.bf16.mxu0 %v4842_v43  ;;  %1142 = vmatprep.subr.bf16.mxu1 %v4845_v49 }
  0x36   :  { %1061 = vmatpush1.bf16.msra.mxu0 %v4840_v46  ;;  %1143 = vmatpush1.bf16.msra.mxu1 %v4843_v50  ;;  %v4905_v46 = vld [vmem:[%s7195_s24 + $0x22c] ss:$16 sps:$4 sm:$0xff]  }
  0x37   :  { %1062 = vmatprep.subr.bf16.mxu0 %v4848_v47  ;;  %1144 = vmatprep.subr.bf16.mxu1 %v4851_v52  ;;  %v4903_v52 = vld [vmem:[%s7195_s24 + $0x228] ss:$16 sps:$4 sm:$0xff]  }
  0x3a   :  { %1063 = vmatpush1.bf16.msra.mxu0 %v4846_v51  ;;  %1145 = vmatpush1.bf16.msra.mxu1 %v4849_v56  ;;  %v4900_v51 = vld [vmem:[%s7195_s24 + $0x220] ss:$16 sps:$4 sm:$0xff]  }
  0x3b   :  { %1064 = vmatprep.subr.bf16.mxu0 %v4854_v53  ;;  %1146 = vmatprep.subr.bf16.mxu1 %v4857_v57  ;;  %v4908_v53 = vld [vmem:[%s7195_s24 + $0x244] ss:$16 sps:$4 sm:$0xff]   ;;  %v4906_v57 = vld [vmem:[%s7195_s24 + $0x240] ss:$16 sps:$4 sm:$0xff]  }
  0x3e   :  { %1065 = vmatpush1.bf16.msra.mxu0 %v4852_v54  ;;  %1147 = vmatpush1.bf16.msra.mxu1 %v4855_v60  ;;  %v4911_v54 = vld [vmem:[%s7195_s24 + $0x24c] ss:$16 sps:$4 sm:$0xff]  }
  0x3f   :  { %1066 = vmatprep.subr.bf16.mxu0 %v4860_v55  ;;  %1148 = vmatprep.subr.bf16.mxu1 %v4863_v61  ;;  %v4917_v60 = vld [vmem:[%s7195_s24 + $0x26c] ss:$16 sps:$4 sm:$0xff]   ;;  %v4912_v61 = vld [vmem:[%s7195_s24 + $0x260] ss:$16 sps:$4 sm:$0xff]  }
  0x42   :  { %1067 = vmatpush1.bf16.msra.mxu0 %v4858_v58  ;;  %1149 = vmatpush1.bf16.msra.mxu1 %v4861_v0  ;;  %v4909_v58 = vld [vmem:[%s7195_s24 + $0x248] ss:$16 sps:$4 sm:$0xff]   ;;  %v4923_v0 = vld [vmem:[%s7195_s24 + $0x28c] ss:$16 sps:$4 sm:$0xff]  }
  0x43   :  { %1068 = vmatprep.subr.bf16.mxu0 %v4866_v59  ;;  %1150 = vmatprep.subr.bf16.mxu1 %v4869_v1  ;;  %v4914_v59 = vld [vmem:[%s7195_s24 + $0x264] ss:$16 sps:$4 sm:$0xff]   ;;  %v4918_v1 = vld [vmem:[%s7195_s24 + $0x280] ss:$16 sps:$4 sm:$0xff]  }
  0x46   :  { %1069 = vmatpush1.bf16.msra.mxu0 %v4864_v62  ;;  %1151 = vmatpush1.bf16.msra.mxu1 %v4867_v4  ;;  %v4915_v62 = vld [vmem:[%s7195_s24 + $0x268] ss:$16 sps:$4 sm:$0xff]   ;;  %v4929_v4 = vld [vmem:[%s7195_s24 + $0x2ac] ss:$16 sps:$4 sm:$0xff]  }
  0x47   :  { %1070 = vmatprep.subr.bf16.mxu0 %v4872_v63  ;;  %1152 = vmatprep.subr.bf16.mxu1 %v4875_v5  ;;  %v4920_v63 = vld [vmem:[%s7195_s24 + $0x284] ss:$16 sps:$4 sm:$0xff]   ;;  %v4924_v5 = vld [vmem:[%s7195_s24 + $0x2a0] ss:$16 sps:$4 sm:$0xff]  }
  0x4a   :  { %1071 = vmatpush1.bf16.msra.mxu0 %v4870_v2  ;;  %1153 = vmatpush1.bf16.msra.mxu1 %v4873_v7  ;;  %v4921_v2 = vld [vmem:[%s7195_s24 + $0x288] ss:$16 sps:$4 sm:$0xff]   ;;  %v4932_v7 = vld [vmem:[%s7195_s24 + $0x2c4] ss:$16 sps:$4 sm:$0xff]  }
  0x4b   :  { %1072 = vmatprep.subr.bf16.mxu0 %v4878_v3  ;;  %1154 = vmatprep.subr.bf16.mxu1 %v4881_v8  ;;  %v4926_v3 = vld [vmem:[%s7195_s24 + $0x2a4] ss:$16 sps:$4 sm:$0xff]   ;;  %v4935_v8 = vld [vmem:[%s7195_s24 + $0x2cc] ss:$16 sps:$4 sm:$0xff]  }
  0x4e   :  { %1073 = vmatpush1.bf16.msra.mxu0 %v4876_v6  ;;  %1155 = vmatpush1.bf16.msra.mxu1 %v4879_v9  ;;  %v4927_v6 = vld [vmem:[%s7195_s24 + $0x2a8] ss:$16 sps:$4 sm:$0xff]   ;;  %v4930_v9 = vld [vmem:[%s7195_s24 + $0x2c0] ss:$16 sps:$4 sm:$0xff]  }
  0x4f   :  { %1074 = vmatprep.subr.bf16.mxu0 %v4884_v10  ;;  %1156 = vmatprep.subr.bf16.mxu1 %v4887_v11  ;;  %v4933_v10 = vld [vmem:[%s7195_s24 + $0x2c8] ss:$16 sps:$4 sm:$0xff]   ;;  %v4938_v11 = vld [vmem:[%s7195_s24 + $0x2e4] ss:$16 sps:$4 sm:$0xff]  }
  0x52   :  { %1075 = vmatpush1.bf16.msra.mxu0 %v4882_v12  ;;  %1157 = vmatpush1.bf16.msra.mxu1 %v4885_v13  ;;  %v4941_v12 = vld [vmem:[%s7195_s24 + $0x2ec] ss:$16 sps:$4 sm:$0xff]   ;;  %v4936_v13 = vld [vmem:[%s7195_s24 + $0x2e0] ss:$16 sps:$4 sm:$0xff]  }
  0x53   :  { %1076 = vmatprep.subr.bf16.mxu0 %v4890_v14  ;;  %1158 = vmatprep.subr.bf16.mxu1 %v4893_v15  ;;  %v4939_v14 = vld [vmem:[%s7195_s24 + $0x2e8] ss:$16 sps:$4 sm:$0xff]   ;;  %v4944_v15 = vld [vmem:[%s7195_s24 + $0x304] ss:$16 sps:$4 sm:$0xff]  }
  0x56   :  { %1077 = vmatpush1.bf16.msra.mxu0 %v4888_v16  ;;  %1159 = vmatpush1.bf16.msra.mxu1 %v4891_v17  ;;  %v4947_v16 = vld [vmem:[%s7195_s24 + $0x30c] ss:$16 sps:$4 sm:$0xff]   ;;  %v4942_v17 = vld [vmem:[%s7195_s24 + $0x300] ss:$16 sps:$4 sm:$0xff]  }
  0x57   :  { %1087 = vmatprep.subr.bf16.mxu0 %v4896_v18  ;;  %1169 = vmatprep.subr.bf16.mxu1 %v4899_v19  ;;  %v4945_v18 = vld [vmem:[%s7195_s24 + $0x308] ss:$16 sps:$4 sm:$0xff]   ;;  %v4950_v19 = vld [vmem:[%s7195_s24 + $0x324] ss:$16 sps:$4 sm:$0xff]  }
  0xec   :  { %v214_v27 = vpop.f32.mrb[0].mxu0  ;;  %v5861_v39 = vpop.f32.mrb[0].mxu1 }
  0xed   :  { %v215_v29 = vadd.f32 %v214_v27, %v79_v25  ;;  %v216_v30 = vpop.f32.mrb[1].mxu0  ;;  %v257_v43 = vpop.f32.mrb[1].mxu1  ;;  %v4948_v25 = vld [vmem:[%s7195_s24 + $0x320] ss:$16 sps:$4 sm:$0xff]   ;;  %v4956_v27 = vld [vmem:[%s7195_s24 + $0x344] ss:$16 sps:$4 sm:$0xff]  }
  0xee   :  { %v217_v31 = vadd.f32 %v216_v30, %v83_v26  ;;  %v218_v32 = vpop.f32.mrb[2].mxu0  ;;  %v258_v47 = vadd.f32 %v257_v43, %v91_v36  ;;  %v259_v48 = vpop.f32.mrb[2].mxu1  ;;  %v4951_v26 = vld [vmem:[%s7195_s24 + $0x328] ss:$16 sps:$4 sm:$0xff]   ;;  %v4954_v30 = vld [vmem:[%s7195_s24 + $0x340] ss:$16 sps:$4 sm:$0xff]  }
  0xef   :  { %vm262_vm1 = vcmp.ge.f32.partialorder %v215_v29, 0.0  ;;  %v266_v33 = vmul.f32 0.01, %v215_v29  ;;  %v219_v34 = vpop.f32.mrb[3].mxu0  ;;  %v260_v49 = vpop.f32.mrb[3].mxu1 }
  0xf0   :  { %vm263_vm2 = vcmp.ge.f32.partialorder %v217_v31, 0.0  ;;  %v267_v35 = vmul.f32 0.01, %v217_v31  ;;  %vm265_vm3 = vcmp.ge.f32.partialorder %v258_v47, 0.0  ;;  %v269_v50 = vmul.f32 0.01, %v258_v47 }
  0xf1   :  { %v270_v37 = vsel %vm262_vm1, %v215_v29, %v266_v33  ;;  %v4959_v29 = vld [vmem:[%s7195_s24 + $0x34c] ss:$16 sps:$4 sm:$0xff]   ;;  %v4962_v32 = vld [vmem:[%s7195_s24 + $0x364] ss:$16 sps:$4 sm:$0xff]   ;;  %v4960_v34 = vld [vmem:[%s7195_s24 + $0x360] ss:$16 sps:$4 sm:$0xff]  }
  0xf2   :  { %v271_v38 = vsel %vm263_vm2, %v217_v31, %v267_v35  ;;  %v274_v44 = vpack.c.bf16 %v270_v37, %v270_v37  ;;  %v273_v55 = vsel %vm265_vm3, %v258_v47, %v269_v50  ;;  %v4957_v31 = vld [vmem:[%s7195_s24 + $0x348] ss:$16 sps:$4 sm:$0xff]   ;;  %v4965_v33 = vld [vmem:[%s7195_s24 + $0x36c] ss:$16 sps:$4 sm:$0xff]   ;;  %v4968_v36 = vld [vmem:[%s7195_s24 + $0x384] ss:$16 sps:$4 sm:$0xff]  }
  0xf3   :  { %v275_v40 = vpack.c.bf16 %v271_v38, %v271_v38  ;;  %v277_v56 = vpack.c.bf16 %v273_v55, %v273_v55  ;;  %v4963_v35 = vld [vmem:[%s7195_s24 + $0x368] ss:$16 sps:$4 sm:$0xff]   ;;  %v4971_v37 = vld [vmem:[%s7195_s24 + $0x38c] ss:$16 sps:$4 sm:$0xff]   ;;  %v6008_v38 = vsub.s32 2, %v5839_v21 }
  0xf4   :  { %v4977_v21 = vld [vmem:[%s7195_s24 + $0x3ac] ss:$16 sps:$4 sm:$0xff]   ;;  %v4978_v48 = vld [vmem:[%s7195_s24 + $0x3c0] ss:$16 sps:$4 sm:$0xff]   ;;  %v4981_v49 = vld [vmem:[%s7195_s24 + $0x3c8] ss:$16 sps:$4 sm:$0xff]  }
  0xf5   :  { %1078 = vmatprep.mubr.bf16.mxu0 %v275_v40  ;;  %1160 = vmatprep.mubr.bf16.mxu1 %v275_v40  ;;  %v4966_v40 = vld [vmem:[%s7195_s24 + $0x380] ss:$16 sps:$4 sm:$0xff]   ;;  %v87_v43 = vrot.slane %v5847_v23, %v6008_v38  ;;  %v4983_v23 = vld [vmem:[%s7195_s24 + $0x3cc] ss:$16 sps:$4 sm:$0xff]   ;;  %v4986_v50 = vld [vmem:[%s7195_s24 + $0x3e4] ss:$16 sps:$4 sm:$0xff]  }
  0xf6   :  { %1079 = vmatmul.mubr.bf16.vlgmr.msra.gmra.mrb[4].mxu0 %v274_v44  ;;  %1161 = vmatmul.mubr.bf16.vlgmr.msra.gmra.mrb[4].mxu1 %v274_v44  ;;  %v4972_v44 = vld [vmem:[%s7195_s24 + $0x3a0] ss:$16 sps:$4 sm:$0xff]  }
  0xf7   :  { %1088 = vmatpush1.bf16.msra.mxu0 %v4894_v41  ;;  %1170 = vmatpush1.bf16.msra.mxu1 %v4897_v42  ;;  %v4969_v41 = vld [vmem:[%s7195_s24 + $0x388] ss:$16 sps:$4 sm:$0xff]   ;;  %v4974_v42 = vld [vmem:[%s7195_s24 + $0x3a4] ss:$16 sps:$4 sm:$0xff]   ;;  %v256_v47 = vadd.f32 %v5861_v39, %v87_v43  ;;  %v4989_v39 = vld [vmem:[%s7195_s24 + $0x3ec] ss:$16 sps:$4 sm:$0xff]  }
  0xf8   :  { %1089 = vmatprep.subr.bf16.mxu0 %v4902_v45  ;;  %1171 = vmatprep.subr.bf16.mxu1 %v4905_v46  ;;  %v4975_v45 = vld [vmem:[%s7195_s24 + $0x3a8] ss:$16 sps:$4 sm:$0xff]   ;;  %v4980_v46 = vld [vmem:[%s7195_s24 + $0x3c4] ss:$16 sps:$4 sm:$0xff]  }
  0xf9   :  { %1119 = vmatprep.mubr.bf16.mxu0 %v277_v56  ;;  %1201 = vmatprep.mubr.bf16.mxu1 %v277_v56  ;;  %vm264_vm4 = vcmp.ge.f32.partialorder %v256_v47, 0.0  ;;  %v4990_v56 = vld [vmem:[%s7175_s4] ss:$8 sps:$4 sm:$0xff]  }
  0xfb   :  { %1090 = vmatpush1.bf16.msra.mxu0 %v4900_v51  ;;  %1172 = vmatpush1.bf16.msra.mxu1 %v4903_v52  ;;  %v268_v51 = vmul.f32 0.01, %v256_v47  ;;  %v4984_v52 = vld [vmem:[%s7195_s24 + $0x3e0] ss:$16 sps:$4 sm:$0xff]  }
  0xfc   :  { %1091 = vmatprep.subr.bf16.mxu0 %v4908_v53  ;;  %1173 = vmatprep.subr.bf16.mxu1 %v4911_v54  ;;  %v4987_v53 = vld [vmem:[%s7195_s24 + $0x3e8] ss:$16 sps:$4 sm:$0xff]   ;;  %v4992_v54 = vld [vmem:[%s7175_s4 + $0x4] ss:$8 sps:$4 sm:$0xff]  }
  0xfd   :  { %v272_v55 = vsel %vm264_vm4, %v256_v47, %v268_v51 }
  0xff   :  { %1092 = vmatpush1.bf16.msra.mxu0 %v4906_v57  ;;  %1174 = vmatpush1.bf16.msra.mxu1 %v4909_v58  ;;  %v276_v57 = vpack.c.bf16 %v272_v55, %v272_v55  ;;  %v4995_v58 = vld [vmem:[%s7175_s4 + $0x14] ss:$8 sps:$4 sm:$0xff]  }
 0x100   :  { %1093 = vmatprep.subr.bf16.mxu0 %v4914_v59  ;;  %1175 = vmatprep.subr.bf16.mxu1 %v4917_v60  ;;  %v4993_v59 = vld [vmem:[%s7175_s4 + $0x10] ss:$8 sps:$4 sm:$0xff]   ;;  %v4998_v60 = vld [vmem:[%s7175_s4 + $0x24] ss:$8 sps:$4 sm:$0xff]  }
 0x103   :  { %1094 = vmatpush1.bf16.msra.mxu0 %v4912_v61  ;;  %1176 = vmatpush1.bf16.msra.mxu1 %v4915_v62  ;;  %v4996_v61 = vld [vmem:[%s7175_s4 + $0x20] ss:$8 sps:$4 sm:$0xff]   ;;  %v5001_v62 = vld [vmem:[%s7175_s4 + $0x34] ss:$8 sps:$4 sm:$0xff]  }
 0x104   :  { %1095 = vmatprep.subr.bf16.mxu0 %v4920_v63  ;;  %1177 = vmatprep.subr.bf16.mxu1 %v4923_v0  ;;  %v4999_v63 = vld [vmem:[%s7175_s4 + $0x30] ss:$8 sps:$4 sm:$0xff]   ;;  %v5004_v0 = vld [vmem:[%s7175_s4 + $0x44] ss:$8 sps:$4 sm:$0xff]  }
 0x107   :  { %1096 = vmatpush1.bf16.msra.mxu0 %v4918_v1  ;;  %1178 = vmatpush1.bf16.msra.mxu1 %v4921_v2  ;;  %v5002_v1 = vld [vmem:[%s7175_s4 + $0x40] ss:$8 sps:$4 sm:$0xff]   ;;  %v5007_v2 = vld [vmem:[%s7175_s4 + $0x54] ss:$8 sps:$4 sm:$0xff]  }
 0x108   :  { %1097 = vmatprep.subr.bf16.mxu0 %v4926_v3  ;;  %1179 = vmatprep.subr.bf16.mxu1 %v4929_v4  ;;  %v5005_v3 = vld [vmem:[%s7175_s4 + $0x50] ss:$8 sps:$4 sm:$0xff]   ;;  %v5010_v4 = vld [vmem:[%s7175_s4 + $0x64] ss:$8 sps:$4 sm:$0xff]  }
 0x10b   :  { %1098 = vmatpush1.bf16.msra.mxu0 %v4924_v5  ;;  %1180 = vmatpush1.bf16.msra.mxu1 %v4927_v6  ;;  %v5008_v5 = vld [vmem:[%s7175_s4 + $0x60] ss:$8 sps:$4 sm:$0xff]   ;;  %v5013_v6 = vld [vmem:[%s7175_s4 + $0x74] ss:$8 sps:$4 sm:$0xff]  }
 0x10c   :  { %1099 = vmatprep.subr.bf16.mxu0 %v4932_v7  ;;  %1181 = vmatprep.subr.bf16.mxu1 %v4935_v8  ;;  %v5011_v7 = vld [vmem:[%s7175_s4 + $0x70] ss:$8 sps:$4 sm:$0xff]   ;;  %v5016_v8 = vld [vmem:[%s7175_s4 + $0x84] ss:$8 sps:$4 sm:$0xff]  }
 0x10f   :  { %1100 = vmatpush1.bf16.msra.mxu0 %v4930_v9  ;;  %1182 = vmatpush1.bf16.msra.mxu1 %v4933_v10  ;;  %v5014_v9 = vld [vmem:[%s7175_s4 + $0x80] ss:$8 sps:$4 sm:$0xff]   ;;  %v5019_v10 = vld [vmem:[%s7175_s4 + $0x94] ss:$8 sps:$4 sm:$0xff]  }
 0x110   :  { %1101 = vmatprep.subr.bf16.mxu0 %v4938_v11  ;;  %1183 = vmatprep.subr.bf16.mxu1 %v4941_v12  ;;  %v5017_v11 = vld [vmem:[%s7175_s4 + $0x90] ss:$8 sps:$4 sm:$0xff]   ;;  %v5022_v12 = vld [vmem:[%s7175_s4 + $0xa4] ss:$8 sps:$4 sm:$0xff]  }
 0x113   :  { %1102 = vmatpush1.bf16.msra.mxu0 %v4936_v13  ;;  %1184 = vmatpush1.bf16.msra.mxu1 %v4939_v14  ;;  %v5020_v13 = vld [vmem:[%s7175_s4 + $0xa0] ss:$8 sps:$4 sm:$0xff]   ;;  %v5025_v14 = vld [vmem:[%s7175_s4 + $0xb4] ss:$8 sps:$4 sm:$0xff]  }
 0x114   :  { %1103 = vmatprep.subr.bf16.mxu0 %v4944_v15  ;;  %1185 = vmatprep.subr.bf16.mxu1 %v4947_v16  ;;  %v5023_v15 = vld [vmem:[%s7175_s4 + $0xb0] ss:$8 sps:$4 sm:$0xff]   ;;  %v5028_v16 = vld [vmem:[%s7175_s4 + $0xc4] ss:$8 sps:$4 sm:$0xff]  }
 0x117   :  { %1104 = vmatpush1.bf16.msra.mxu0 %v4942_v17  ;;  %1186 = vmatpush1.bf16.msra.mxu1 %v4945_v18  ;;  %v5026_v17 = vld [vmem:[%s7175_s4 + $0xc0] ss:$8 sps:$4 sm:$0xff]   ;;  %v5031_v18 = vld [vmem:[%s7175_s4 + $0xd4] ss:$8 sps:$4 sm:$0xff]  }
 0x118   :  { %1105 = vmatprep.subr.bf16.mxu0 %v4950_v19  ;;  %1187 = vmatprep.subr.bf16.mxu1 %v4953_v20  ;;  %v5029_v19 = vld [vmem:[%s7175_s4 + $0xd0] ss:$8 sps:$4 sm:$0xff]   ;;  %v5034_v20 = vld [vmem:[%s7175_s4 + $0xe4] ss:$8 sps:$4 sm:$0xff]  }
 0x11b   :  { %1106 = vmatpush1.bf16.msra.mxu0 %v4948_v25  ;;  %1188 = vmatpush1.bf16.msra.mxu1 %v4951_v26  ;;  %v5032_v25 = vld [vmem:[%s7175_s4 + $0xe0] ss:$8 sps:$4 sm:$0xff]   ;;  %v5037_v26 = vld [vmem:[%s7175_s4 + $0xf4] ss:$8 sps:$4 sm:$0xff]  }
 0x11c   :  { %1107 = vmatprep.subr.bf16.mxu0 %v4956_v27  ;;  %1189 = vmatprep.subr.bf16.mxu1 %v4959_v29  ;;  %v5035_v27 = vld [vmem:[%s7175_s4 + $0xf0] ss:$8 sps:$4 sm:$0xff]   ;;  %v5040_v29 = vld [vmem:[%s7175_s4 + $0x104] ss:$8 sps:$4 sm:$0xff]  }
 0x11f   :  { %1108 = vmatpush1.bf16.msra.mxu0 %v4954_v30  ;;  %1190 = vmatpush1.bf16.msra.mxu1 %v4957_v31  ;;  %v5086_v30 = vld [vmem:[%s7177_s6 + $0x40] sm:$0xff]  }
 0x120   :  { %1109 = vmatprep.subr.bf16.mxu0 %v4962_v32  ;;  %1191 = vmatprep.subr.bf16.mxu1 %v4965_v33  ;;  %v5087_v31 = vld [vmem:[%s7177_s6] sm:$0xff]   ;;  %v5088_v32 = vld [vmem:[%s7177_s6 + $0x48] sm:$0xff]  }
 0x121   :  { %v5089_v33 = vld [vmem:[%s7177_s6 + $0x8] sm:$0xff]  }
 0x123   :  { %1110 = vmatpush1.bf16.msra.mxu0 %v4960_v34  ;;  %1192 = vmatpush1.bf16.msra.mxu1 %v4963_v35  ;;  %v5090_v34 = vld [vmem:[%s7177_s6 + $0x50] sm:$0xff]  }
 0x124   :  { %1111 = vmatprep.subr.bf16.mxu0 %v4968_v36  ;;  %1193 = vmatprep.subr.bf16.mxu1 %v4971_v37  ;;  %v5091_v35 = vld [vmem:[%s7177_s6 + $0x10] sm:$0xff]   ;;  %v5092_v36 = vld [vmem:[%s7177_s6 + $0x58] sm:$0xff]  }
 0x125   :  { %v5093_v37 = vld [vmem:[%s7177_s6 + $0x18] sm:$0xff]  }
 0x127   :  { %1112 = vmatpush1.bf16.msra.mxu0 %v4966_v40  ;;  %1194 = vmatpush1.bf16.msra.mxu1 %v4969_v41  ;;  %v5094_v40 = vld [vmem:[%s7177_s6 + $0x60] sm:$0xff]  }
 0x128   :  { %1113 = vmatprep.subr.bf16.mxu0 %v4974_v42  ;;  %1195 = vmatprep.subr.bf16.mxu1 %v4977_v21  ;;  %v5095_v41 = vld [vmem:[%s7177_s6 + $0x20] sm:$0xff]   ;;  %v5096_v42 = vld [vmem:[%s7177_s6 + $0x68] sm:$0xff]  }
 0x129   :  { %v5097_v21 = vld [vmem:[%s7177_s6 + $0x28] sm:$0xff]  }
 0x12b   :  { %1114 = vmatpush1.bf16.msra.mxu0 %v4972_v44  ;;  %1196 = vmatpush1.bf16.msra.mxu1 %v4975_v45 }
 0x12c   :  { %1115 = vmatprep.subr.bf16.mxu0 %v4980_v46  ;;  %1197 = vmatprep.subr.bf16.mxu1 %v4983_v23 }
 0x12f   :  { %1116 = vmatpush1.bf16.msra.mxu0 %v4978_v48  ;;  %1198 = vmatpush1.bf16.msra.mxu1 %v4981_v49 }
 0x130   :  { %1117 = vmatprep.subr.bf16.mxu0 %v4986_v50  ;;  %1199 = vmatprep.subr.bf16.mxu1 %v4989_v39 }
 0x133   :  { %1118 = vmatpush1.bf16.msra.mxu0 %v4984_v52  ;;  %1200 = vmatpush1.bf16.msra.mxu1 %v4987_v53 }
 0x134   :  { %1622 = vmatprep.subr.bf16.mxu0 %v4992_v54  ;;  %4656 = vmatprep.subr.bf16.mxu1 %v5086_v30  ;;  %v5083_v30 = vld [vmem:[%s7175_s4 + $0x1f0] ss:$8 sps:$4 sm:$0xff]  }
 0x136   :  { %1120 = vmatmul.mubr.bf16.vlgmr.msra.gmra.mrb[4].mxu0 %v276_v57  ;;  %1202 = vmatmul.mubr.bf16.vlgmr.msra.gmra.mrb[4].mxu1 %v276_v57 }
 0x137   :  { %1623 = vmatpush1.bf16.msra.mxu0 %v4990_v56  ;;  %4657 = vmatpush3.bf16.msra.mxu1 %v5087_v31  ;;  %v5038_v56 = vld [vmem:[%s7175_s4 + $0x100] ss:$8 sps:$4 sm:$0xff]  }
 0x138   :  { %1624 = vmatprep.subr.bf16.mxu0 %v4995_v58  ;;  %4658 = vmatprep.subr.bf16.mxu1 %v5088_v32  ;;  %v5043_v58 = vld [vmem:[%s7175_s4 + $0x114] ss:$8 sps:$4 sm:$0xff]  }
 0x13b   :  { %1625 = vmatpush1.bf16.msra.mxu0 %v4993_v59  ;;  %4659 = vmatpush3.bf16.msra.mxu1 %v5089_v33  ;;  %v5098_v33 = vld [vmem:[%s7177_s6 + $0x70] sm:$0xff]  }
 0x13c   :  { %1626 = vmatprep.subr.bf16.mxu0 %v4998_v60  ;;  %4660 = vmatprep.subr.bf16.mxu1 %v5090_v34  ;;  %v5041_v60 = vld [vmem:[%s7175_s4 + $0x110] ss:$8 sps:$4 sm:$0xff]  }
 0x13d   :  { %v5099_v34 = vld [vmem:[%s7177_s6 + $0x30] sm:$0xff]  }
 0x13f   :  { %1627 = vmatpush1.bf16.msra.mxu0 %v4996_v61  ;;  %4661 = vmatpush3.bf16.msra.mxu1 %v5091_v35  ;;  %v5046_v61 = vld [vmem:[%s7175_s4 + $0x124] ss:$8 sps:$4 sm:$0xff]   ;;  %v5100_v35 = vld [vmem:[%s7177_s6 + $0x78] sm:$0xff]  }
 0x140   :  { %1628 = vmatprep.subr.bf16.mxu0 %v5001_v62  ;;  %4662 = vmatprep.subr.bf16.mxu1 %v5092_v36  ;;  %v5044_v62 = vld [vmem:[%s7175_s4 + $0x120] ss:$8 sps:$4 sm:$0xff]   ;;  %v5101_v36 = vld [vmem:[%s7177_s6 + $0x38] sm:$0xff]  }
 0x143   :  { %1629 = vmatpush1.bf16.msra.mxu0 %v4999_v63  ;;  %4663 = vmatpush3.bf16.msra.mxu1 %v5093_v37  ;;  %v5049_v63 = vld [vmem:[%s7175_s4 + $0x134] ss:$8 sps:$4 sm:$0xff]   ;;  %v5102_v37 = vld [vmem:[%s7178_s8 + $0x40] sm:$0xff]  }
 0x144   :  { %1630 = vmatprep.subr.bf16.mxu0 %v5004_v0  ;;  %4664 = vmatprep.subr.bf16.mxu1 %v5094_v40  ;;  %v5047_v0 = vld [vmem:[%s7175_s4 + $0x130] ss:$8 sps:$4 sm:$0xff]   ;;  %v1290_v40 = vld [vmem:[%s7180_s5] sm:$0x3] }
 0x147   :  { %1631 = vmatpush1.bf16.msra.mxu0 %v5002_v1  ;;  %4665 = vmatpush3.bf16.msra.mxu1 %v5095_v41  ;;  %v5052_v1 = vld [vmem:[%s7175_s4 + $0x144] ss:$8 sps:$4 sm:$0xff]   ;;  %v1295_v41 = vrot.slane %v1290_v40, %v5842_v22 }
 0x148   :  { %1632 = vmatprep.subr.bf16.mxu0 %v5007_v2  ;;  %4666 = vmatprep.subr.bf16.mxu1 %v5096_v42  ;;  %v5050_v2 = vld [vmem:[%s7175_s4 + $0x140] ss:$8 sps:$4 sm:$0xff]   ;;  %v1299_v42 = vrot.slane %v1290_v40, %v5850_v24  ;;  %v5165_v40 = vld [vmem:[%s7179_s10 + $0xf4] ss:$8 sps:$4 sm:$0xff]  }
 0x14b   :  { %1633 = vmatpush1.bf16.msra.mxu0 %v5005_v3  ;;  %4667 = vmatpush3.bf16.msra.mxu1 %v5097_v21  ;;  %v5055_v3 = vld [vmem:[%s7175_s4 + $0x154] ss:$8 sps:$4 sm:$0xff]  }
 0x14c   :  { %1634 = vmatprep.subr.bf16.mxu0 %v5010_v4  ;;  %v5053_v4 = vld [vmem:[%s7175_s4 + $0x150] ss:$8 sps:$4 sm:$0xff]   ;;  %4668 = vmatprep.subr.bf16.mxu1 %v5098_v33  ;;  %v5154_v33 = vld [vmem:[%s7179_s10 + $0xc0] ss:$8 sps:$4 sm:$0xff]  }
 0x14f   :  { %1635 = vmatpush1.bf16.msra.mxu0 %v5008_v5  ;;  %v5058_v5 = vld [vmem:[%s7175_s4 + $0x164] ss:$8 sps:$4 sm:$0xff]   ;;  %4669 = vmatpush3.bf16.msra.mxu1 %v5099_v34  ;;  %v5159_v34 = vld [vmem:[%s7179_s10 + $0xd4] ss:$8 sps:$4 sm:$0xff]  }
 0x150   :  { %1636 = vmatprep.subr.bf16.mxu0 %v5013_v6  ;;  %v5056_v6 = vld [vmem:[%s7175_s4 + $0x160] ss:$8 sps:$4 sm:$0xff]   ;;  %4670 = vmatprep.subr.bf16.mxu1 %v5100_v35  ;;  %v5157_v35 = vld [vmem:[%s7179_s10 + $0xd0] ss:$8 sps:$4 sm:$0xff]  }
 0x153   :  { %1637 = vmatpush1.bf16.msra.mxu0 %v5011_v7  ;;  %v5061_v7 = vld [vmem:[%s7175_s4 + $0x174] ss:$8 sps:$4 sm:$0xff]   ;;  %4671 = vmatpush3.bf16.msra.mxu1 %v5101_v36  ;;  %v5162_v36 = vld [vmem:[%s7179_s10 + $0xe4] ss:$8 sps:$4 sm:$0xff]  }
 0x154   :  { %1638 = vmatprep.subr.bf16.mxu0 %v5016_v8  ;;  %v5059_v8 = vld [vmem:[%s7175_s4 + $0x170] ss:$8 sps:$4 sm:$0xff]   ;;  %4678 = vmatprep.subr.bf16.mxu1 %v5102_v37  ;;  %v5160_v37 = vld [vmem:[%s7179_s10 + $0xe0] ss:$8 sps:$4 sm:$0xff]  }
 0x157   :  { %1639 = vmatpush1.bf16.msra.mxu0 %v5014_v9  ;;  %v5064_v9 = vld [vmem:[%s7175_s4 + $0x184] ss:$8 sps:$4 sm:$0xff]  }
 0x158   :  { %1640 = vmatprep.subr.bf16.mxu0 %v5019_v10  ;;  %v5062_v10 = vld [vmem:[%s7175_s4 + $0x180] ss:$8 sps:$4 sm:$0xff]  }
 0x15b   :  { %1641 = vmatpush1.bf16.msra.mxu0 %v5017_v11  ;;  %v5067_v11 = vld [vmem:[%s7175_s4 + $0x194] ss:$8 sps:$4 sm:$0xff]  }
 0x15c   :  { %1642 = vmatprep.subr.bf16.mxu0 %v5022_v12  ;;  %v5065_v12 = vld [vmem:[%s7175_s4 + $0x190] ss:$8 sps:$4 sm:$0xff]  }
 0x15f   :  { %1643 = vmatpush1.bf16.msra.mxu0 %v5020_v13  ;;  %v5070_v13 = vld [vmem:[%s7175_s4 + $0x1a4] ss:$8 sps:$4 sm:$0xff]  }
 0x160   :  { %1644 = vmatprep.subr.bf16.mxu0 %v5025_v14  ;;  %v5068_v14 = vld [vmem:[%s7175_s4 + $0x1a0] ss:$8 sps:$4 sm:$0xff]  }
 0x163   :  { %1645 = vmatpush1.bf16.msra.mxu0 %v5023_v15  ;;  %v5073_v15 = vld [vmem:[%s7175_s4 + $0x1b4] ss:$8 sps:$4 sm:$0xff]  }
 0x164   :  { %1646 = vmatprep.subr.bf16.mxu0 %v5028_v16  ;;  %v5071_v16 = vld [vmem:[%s7175_s4 + $0x1b0] ss:$8 sps:$4 sm:$0xff]  }
 0x167   :  { %1647 = vmatpush1.bf16.msra.mxu0 %v5026_v17  ;;  %v5076_v17 = vld [vmem:[%s7175_s4 + $0x1c4] ss:$8 sps:$4 sm:$0xff]  }
 0x168   :  { %1648 = vmatprep.subr.bf16.mxu0 %v5031_v18  ;;  %v5074_v18 = vld [vmem:[%s7175_s4 + $0x1c0] ss:$8 sps:$4 sm:$0xff]  }
 0x16b   :  { %1649 = vmatpush1.bf16.msra.mxu0 %v5029_v19  ;;  %v5079_v19 = vld [vmem:[%s7175_s4 + $0x1d4] ss:$8 sps:$4 sm:$0xff]  }
 0x16c   :  { %1650 = vmatprep.subr.bf16.mxu0 %v5034_v20  ;;  %v5077_v20 = vld [vmem:[%s7175_s4 + $0x1d0] ss:$8 sps:$4 sm:$0xff]  }
 0x16f   :  { %1651 = vmatpush1.bf16.msra.mxu0 %v5032_v25  ;;  %v5082_v25 = vld [vmem:[%s7175_s4 + $0x1e4] ss:$8 sps:$4 sm:$0xff]  }
 0x170   :  { %1652 = vmatprep.subr.bf16.mxu0 %v5037_v26  ;;  %v5080_v26 = vld [vmem:[%s7175_s4 + $0x1e0] ss:$8 sps:$4 sm:$0xff]  }
 0x173   :  { %1653 = vmatpush1.bf16.msra.mxu0 %v5035_v27  ;;  %v5085_v27 = vld [vmem:[%s7175_s4 + $0x1f4] ss:$8 sps:$4 sm:$0xff]  }
 0x174   :  { %1663 = vmatprep.subr.bf16.mxu0 %v5040_v29 }
 0x209   :  { %v1121_v43 = vpop.f32.mrb[4].mxu0  ;;  %v6190_v44 = vpop.f32.mrb[4].mxu1 }
 0x20a   :  { %vm1210_vm5 = vcmp.ge.f32.partialorder %v1121_v43, 0.0  ;;  %v1214_v45 = vmul.f32 0.01, %v1121_v43  ;;  %v1123_v46 = vpop.f32.mrb[5].mxu0  ;;  %v1205_v23 = vpop.f32.mrb[5].mxu1  ;;  %vm1212_vm8 = vcmp.ge.f32.partialorder %v6190_v44, 0.0 }
 0x20b   :  { %vm1211_vm6 = vcmp.ge.f32.partialorder %v1123_v46, 0.0  ;;  %v1215_v47 = vmul.f32 0.01, %v1123_v46  ;;  %v1125_v48 = vpop.f32.mrb[6].mxu0  ;;  %v1207_v49 = vpop.f32.mrb[6].mxu1  ;;  %vm1213_vm7 = vcmp.ge.f32.partialorder %v1205_v23, 0.0 }
 0x20c   :  { %v1218_v50 = vsel %vm1210_vm5, %v1121_v43, %v1214_v45  ;;  %v1217_v39 = vmul.f32 0.01, %v1205_v23  ;;  %v1126_v51 = vpop.f32.mrb[7].mxu0  ;;  %v1208_v52 = vpop.f32.mrb[7].mxu1  ;;  %v1216_v29 = vmul.f32 0.01, %v6190_v44 }
 0x20d   :  { %v1219_v53 = vsel %vm1211_vm6, %v1123_v46, %v1215_v47  ;;  %v1222_v57 = vpack.c.bf16 %v1218_v50, %v1218_v50  ;;  %v5103_v51 = vld [vmem:[%s7178_s8] sm:$0xff]   ;;  %vm4146_vm6 = vcmask 703664  }
 0x20e   :  { %v1223_v54 = vpack.c.bf16 %v1219_v53, %v1219_v53  ;;  %v1221_v55 = vsel %vm1213_vm7, %v1205_v23, %v1217_v39  ;;  %v1220_v31 = vsel %vm1212_vm8, %v6190_v44, %v1216_v29  ;;  %v5104_v53 = vld [vmem:[%s7178_s8 + $0x48] sm:$0xff]   ;;  %vm4148_vm7 = vcmask 1048240  }
 0x20f   :  { %v1225_v59 = vpack.c.bf16 %v1221_v55, %v1221_v55  ;;  %v1224_v32 = vpack.c.bf16 %v1220_v31, %v1220_v31  ;;  %v5106_v55 = vld [vmem:[%s7178_s8 + $0x50] sm:$0xff]   ;;  %v5148_v29 = vld [vmem:[%s7179_s10 + $0xa0] ss:$8 sps:$4 sm:$0xff]  }
 0x210   :  { %1654 = vmatprep.mubr.bf16.mxu0 %v1223_v54  ;;  %v5105_v54 = vld [vmem:[%s7178_s8 + $0x8] sm:$0xff]   ;;  %v5151_v31 = vld [vmem:[%s7179_s10 + $0xb0] ss:$8 sps:$4 sm:$0xff]  }
 0x211   :  { %1655 = vmatmul.mubr.bf16.vlgmr.msra.gmra.mrb[8].mxu0 %v1222_v57  ;;  %v5108_v57 = vld [vmem:[%s7178_s8 + $0x58] sm:$0xff]  }
 0x212   :  { %1664 = vmatpush1.bf16.msra.mxu0 %v5038_v56  ;;  %1695 = vmatprep.mubr.bf16.mxu0 %v1225_v59  ;;  %v5107_v56 = vld [vmem:[%s7178_s8 + $0x10] sm:$0xff]   ;;  %v5110_v59 = vld [vmem:[%s7178_s8 + $0x60] sm:$0xff]  }
 0x213   :  { %1665 = vmatprep.subr.bf16.mxu0 %v5043_v58  ;;  %v5109_v58 = vld [vmem:[%s7178_s8 + $0x18] sm:$0xff]  }
 0x216   :  { %1666 = vmatpush1.bf16.msra.mxu0 %v5041_v60  ;;  %v5111_v60 = vld [vmem:[%s7178_s8 + $0x20] sm:$0xff]  }
 0x217   :  { %1667 = vmatprep.subr.bf16.mxu0 %v5046_v61  ;;  %v5112_v61 = vld [vmem:[%s7178_s8 + $0x68] sm:$0xff]  }
 0x21a   :  { %1668 = vmatpush1.bf16.msra.mxu0 %v5044_v62  ;;  %v5113_v62 = vld [vmem:[%s7178_s8 + $0x28] sm:$0xff]  }
 0x21b   :  { %1669 = vmatprep.subr.bf16.mxu0 %v5049_v63  ;;  %v5114_v63 = vld [vmem:[%s7178_s8 + $0x70] sm:$0xff]  }
 0x21e   :  { %1670 = vmatpush1.bf16.msra.mxu0 %v5047_v0  ;;  %v5115_v0 = vld [vmem:[%s7178_s8 + $0x30] sm:$0xff]  }
 0x21f   :  { %1671 = vmatprep.subr.bf16.mxu0 %v5052_v1  ;;  %v5116_v1 = vld [vmem:[%s7178_s8 + $0x78] sm:$0xff]  }
 0x222   :  { %1672 = vmatpush1.bf16.msra.mxu0 %v5050_v2  ;;  %v5117_v2 = vld [vmem:[%s7178_s8 + $0x38] sm:$0xff]  }
 0x223   :  { %1673 = vmatprep.subr.bf16.mxu0 %v5055_v3  ;;  %v5120_v3 = vld [vmem:[%s7179_s10 + $0x4] ss:$8 sps:$4 sm:$0xff]  }
 0x226   :  { %1674 = vmatpush1.bf16.msra.mxu0 %v5053_v4  ;;  %v5118_v4 = vld [vmem:[%s7179_s10] ss:$8 sps:$4 sm:$0xff]  }
 0x227   :  { %1675 = vmatprep.subr.bf16.mxu0 %v5058_v5  ;;  %v5123_v5 = vld [vmem:[%s7179_s10 + $0x14] ss:$8 sps:$4 sm:$0xff]  }
 0x22a   :  { %1676 = vmatpush1.bf16.msra.mxu0 %v5056_v6  ;;  %v5121_v6 = vld [vmem:[%s7179_s10 + $0x10] ss:$8 sps:$4 sm:$0xff]  }
 0x22b   :  { %1677 = vmatprep.subr.bf16.mxu0 %v5061_v7  ;;  %v5126_v7 = vld [vmem:[%s7179_s10 + $0x24] ss:$8 sps:$4 sm:$0xff]  }
 0x22e   :  { %1678 = vmatpush1.bf16.msra.mxu0 %v5059_v8  ;;  %v5124_v8 = vld [vmem:[%s7179_s10 + $0x20] ss:$8 sps:$4 sm:$0xff]  }
 0x22f   :  { %1679 = vmatprep.subr.bf16.mxu0 %v5064_v9  ;;  %v5129_v9 = vld [vmem:[%s7179_s10 + $0x34] ss:$8 sps:$4 sm:$0xff]  }
 0x232   :  { %1680 = vmatpush1.bf16.msra.mxu0 %v5062_v10  ;;  %v5127_v10 = vld [vmem:[%s7179_s10 + $0x30] ss:$8 sps:$4 sm:$0xff]  }
 0x233   :  { %1681 = vmatprep.subr.bf16.mxu0 %v5067_v11  ;;  %v5132_v11 = vld [vmem:[%s7179_s10 + $0x44] ss:$8 sps:$4 sm:$0xff]  }
 0x236   :  { %1682 = vmatpush1.bf16.msra.mxu0 %v5065_v12  ;;  %v5130_v12 = vld [vmem:[%s7179_s10 + $0x40] ss:$8 sps:$4 sm:$0xff]  }
 0x237   :  { %1683 = vmatprep.subr.bf16.mxu0 %v5070_v13  ;;  %v5135_v13 = vld [vmem:[%s7179_s10 + $0x54] ss:$8 sps:$4 sm:$0xff]  }
 0x23a   :  { %1684 = vmatpush1.bf16.msra.mxu0 %v5068_v14  ;;  %v5133_v14 = vld [vmem:[%s7179_s10 + $0x50] ss:$8 sps:$4 sm:$0xff]  }
 0x23b   :  { %1685 = vmatprep.subr.bf16.mxu0 %v5073_v15  ;;  %v5138_v15 = vld [vmem:[%s7179_s10 + $0x64] ss:$8 sps:$4 sm:$0xff]  }
 0x23e   :  { %1686 = vmatpush1.bf16.msra.mxu0 %v5071_v16  ;;  %v5136_v16 = vld [vmem:[%s7179_s10 + $0x60] ss:$8 sps:$4 sm:$0xff]  }
 0x23f   :  { %1687 = vmatprep.subr.bf16.mxu0 %v5076_v17  ;;  %v5141_v17 = vld [vmem:[%s7179_s10 + $0x74] ss:$8 sps:$4 sm:$0xff]  }
 0x242   :  { %1688 = vmatpush1.bf16.msra.mxu0 %v5074_v18  ;;  %v5139_v18 = vld [vmem:[%s7179_s10 + $0x70] ss:$8 sps:$4 sm:$0xff]  }
 0x243   :  { %1689 = vmatprep.subr.bf16.mxu0 %v5079_v19  ;;  %v5144_v19 = vld [vmem:[%s7179_s10 + $0x84] ss:$8 sps:$4 sm:$0xff]  }
 0x246   :  { %1690 = vmatpush1.bf16.msra.mxu0 %v5077_v20  ;;  %v5142_v20 = vld [vmem:[%s7179_s10 + $0x80] ss:$8 sps:$4 sm:$0xff]  }
 0x247   :  { %1691 = vmatprep.subr.bf16.mxu0 %v5082_v25  ;;  %v5147_v25 = vld [vmem:[%s7179_s10 + $0x94] ss:$8 sps:$4 sm:$0xff]  }
 0x24a   :  { %1692 = vmatpush1.bf16.msra.mxu0 %v5080_v26  ;;  %v5145_v26 = vld [vmem:[%s7179_s10 + $0x90] ss:$8 sps:$4 sm:$0xff]  }
 0x24b   :  { %1693 = vmatprep.subr.bf16.mxu0 %v5085_v27  ;;  %v5150_v27 = vld [vmem:[%s7179_s10 + $0xa4] ss:$8 sps:$4 sm:$0xff]  }
 0x24e   :  { %1694 = vmatpush1.bf16.msra.mxu0 %v5083_v30  ;;  %v5153_v30 = vld [vmem:[%s7179_s10 + $0xb4] ss:$8 sps:$4 sm:$0xff]  }
 0x251   :  { %1696 = vmatmul.mubr.bf16.vlgmr.msra.gmra.mrb[8].mxu0 %v1224_v32  ;;  %v5156_v32 = vld [vmem:[%s7179_s10 + $0xc4] ss:$8 sps:$4 sm:$0xff]  }
 0x324   :  { %v1697_v21 = vpop.f32.mrb[8].mxu0 }
 0x325   :  { %v4744_v43 = vadd.f32 %v1697_v21, %v1295_v41  ;;  %v1699_v44 = vpop.f32.mrb[9].mxu0  ;;  %v5163_v41 = vld [vmem:[%s7179_s10 + $0xf0] ss:$8 sps:$4 sm:$0xff]  }
 0x326   :  { %v4745_v45 = vadd.f32 %v1699_v44, %v1299_v42  ;;  %v1701_v46 = vpop.f32.mrb[10].mxu0  ;;  %v5168_v42 = vld [vmem:[%s7181_s12 + $0x4] ss:$16 sps:$4 sm:$0xff]   ;;  %v5166_v21 = vld [vmem:[%s7181_s12] ss:$16 sps:$4 sm:$0xff]  }
 0x327   :  { %vm1704_vm9 = vcmp.ge.f32.partialorder %v4744_v43, 0.0  ;;  %v1706_v23 = vmul.f32 0.01, %v4744_v43  ;;  %v1702_v47 = vpop.f32.mrb[11].mxu0  ;;  %2721 = vmatprep.subr.bf16.mxu0 %v5168_v42  ;;  %v5171_v44 = vld [vmem:[%s7181_s12 + $0xc] ss:$16 sps:$4 sm:$0xff]  }
 0x328   :  { %vm1705_vm10 = vcmp.ge.f32.partialorder %v4745_v45, 0.0  ;;  %v1707_v48 = vmul.f32 0.01, %v4745_v45  ;;  %2722 = vmatpush1.bf16.msra.mxu0 %v5166_v21  ;;  %v5177_v46 = vld [vmem:[%s7181_s12 + $0x2c] ss:$16 sps:$4 sm:$0xff]  }
 0x329   :  { %v1708_v49 = vsel %vm1704_vm9, %v4744_v43, %v1706_v23  ;;  %v5169_v43 = vld [vmem:[%s7181_s12 + $0x8] ss:$16 sps:$4 sm:$0xff]   ;;  %v5172_v23 = vld [vmem:[%s7181_s12 + $0x20] ss:$16 sps:$4 sm:$0xff]   ;;  %v5258_v42 = vld [vmem:[%s7181_s12 + $0x1e4] ss:$16 sps:$4 sm:$0xff]  }
 0x32a   :  { %v1709_v50 = vsel %vm1705_vm10, %v4745_v45, %v1707_v48  ;;  %v6311_v52 = vpack.c.bf16 %v1708_v49, %v1708_v49  ;;  %v5174_v45 = vld [vmem:[%s7181_s12 + $0x24] ss:$16 sps:$4 sm:$0xff]   ;;  %v5175_v47 = vld [vmem:[%s7181_s12 + $0x28] ss:$16 sps:$4 sm:$0xff]   ;;  %v5183_v49 = vld [vmem:[%s7181_s12 + $0x4c] ss:$16 sps:$4 sm:$0xff]  }
 0x32b   :  { %v1711_v39 = vpack.c.bf16 %v1709_v50, %v1709_v50  ;;  %2723 = vmatprep.subr.bf16.mxu0 %v5174_v45  ;;  %v5180_v48 = vld [vmem:[%s7181_s12 + $0x44] ss:$16 sps:$4 sm:$0xff]   ;;  %v5178_v50 = vld [vmem:[%s7181_s12 + $0x40] ss:$16 sps:$4 sm:$0xff]   ;;  %v5261_v21 = vld [vmem:[%s7181_s12 + $0x1ec] ss:$16 sps:$4 sm:$0xff]  }
 0x32c   :  { %2724 = vmatpush1.bf16.msra.mxu0 %v5172_v23 }
 0x32d   :  { %1879 = vmatprep.mubr.bf16.mxu1 %v1711_v39  ;;  %2725 = vmatprep.subr.bf16.mxu0 %v5180_v48 }
 0x32e   :  { %1880 = vmatmul.mubr.bf16.vlgmr.msra.gmra.mrb[8].mxu1 %v6311_v52 }
 0x32f   :  { %4679 = vmatpush3.bf16.msra.mxu1 %v5103_v51  ;;  %2054 = vmatprep.mubr.bf16.mxu1 %v1711_v39  ;;  %v5186_v51 = vld [vmem:[%s7181_s12 + $0x64] ss:$16 sps:$4 sm:$0xff]  }
 0x330   :  { %4680 = vmatprep.subr.bf16.mxu1 %v5104_v53  ;;  %2726 = vmatpush1.bf16.msra.mxu0 %v5178_v50  ;;  %v5184_v53 = vld [vmem:[%s7181_s12 + $0x60] ss:$16 sps:$4 sm:$0xff]  }
 0x331   :  { %2727 = vmatprep.subr.bf16.mxu0 %v5186_v51  ;;  %v4381_v51 = vld [vmem:[%s7184_s9] ss:$0 sm:$0xff]  ;;  %s5495_s9 = smov 16  }
 0x333   :  { %4681 = vmatpush3.bf16.msra.mxu1 %v5105_v54  ;;  %v5187_v54 = vld [vmem:[%s7181_s12 + $0x68] ss:$16 sps:$4 sm:$0xff]  }
 0x334   :  { %4682 = vmatprep.subr.bf16.mxu1 %v5106_v55  ;;  %2728 = vmatpush1.bf16.msra.mxu0 %v5184_v53  ;;  %v5190_v55 = vld [vmem:[%s7181_s12 + $0x80] ss:$16 sps:$4 sm:$0xff]  }
 0x337   :  { %4683 = vmatpush3.bf16.msra.mxu1 %v5107_v56  ;;  %v5192_v56 = vld [vmem:[%s7181_s12 + $0x84] ss:$16 sps:$4 sm:$0xff]  }
 0x338   :  { %4684 = vmatprep.subr.bf16.mxu1 %v5108_v57  ;;  %v5193_v57 = vld [vmem:[%s7181_s12 + $0x88] ss:$16 sps:$4 sm:$0xff]   ;;  %2729 = vmatprep.subr.bf16.mxu0 %v5192_v56 }
 0x339   :  { %2730 = vmatpush1.bf16.msra.mxu0 %v5190_v55 }
 0x33b   :  { %4685 = vmatpush3.bf16.msra.mxu1 %v5109_v58  ;;  %v5195_v58 = vld [vmem:[%s7181_s12 + $0x8c] ss:$16 sps:$4 sm:$0xff]  }
 0x33c   :  { %4686 = vmatprep.subr.bf16.mxu1 %v5110_v59  ;;  %v5198_v59 = vld [vmem:[%s7181_s12 + $0xa4] ss:$16 sps:$4 sm:$0xff]  }
 0x33d   :  { %2731 = vmatprep.subr.bf16.mxu0 %v5198_v59 }
 0x33f   :  { %4687 = vmatpush3.bf16.msra.mxu1 %v5111_v60  ;;  %v5201_v60 = vld [vmem:[%s7181_s12 + $0xac] ss:$16 sps:$4 sm:$0xff]  }
 0x340   :  { %4688 = vmatprep.subr.bf16.mxu1 %v5112_v61  ;;  %v5196_v61 = vld [vmem:[%s7181_s12 + $0xa0] ss:$16 sps:$4 sm:$0xff]  }
 0x341   :  { %2732 = vmatpush1.bf16.msra.mxu0 %v5196_v61  ;;  %v5267_v61 = vld [vmem:[%s7185_s14 + $0xc] ss:$16 sps:$4 sm:$0xff]  }
 0x343   :  { %4689 = vmatpush3.bf16.msra.mxu1 %v5113_v62  ;;  %v5199_v62 = vld [vmem:[%s7181_s12 + $0xa8] ss:$16 sps:$4 sm:$0xff]  }
 0x344   :  { %4690 = vmatprep.subr.bf16.mxu1 %v5114_v63  ;;  %v5204_v63 = vld [vmem:[%s7181_s12 + $0xc4] ss:$16 sps:$4 sm:$0xff]  }
 0x345   :  { %2733 = vmatprep.subr.bf16.mxu0 %v5204_v63  ;;  %v2100_v63 = vld [vmem:[%s7186_s11] sm:$0x3] }
 0x347   :  { %4691 = vmatpush3.bf16.msra.mxu1 %v5115_v0  ;;  %v5207_v0 = vld [vmem:[%s7181_s12 + $0xcc] ss:$16 sps:$4 sm:$0xff]  }
 0x348   :  { %4692 = vmatprep.subr.bf16.mxu1 %v5116_v1  ;;  %v5202_v1 = vld [vmem:[%s7181_s12 + $0xc0] ss:$16 sps:$4 sm:$0xff]  }
 0x349   :  { %2734 = vmatpush1.bf16.msra.mxu0 %v5202_v1  ;;  %v2109_v1 = vrot.slane %v2100_v63, %v5850_v24 }
 0x34b   :  { %4693 = vmatpush3.bf16.msra.mxu1 %v5117_v2  ;;  %v5205_v2 = vld [vmem:[%s7181_s12 + $0xc8] ss:$16 sps:$4 sm:$0xff]  }
 0x34c   :  { %2272 = vmatprep.subr.bf16.mxu1 %v5120_v3  ;;  %v5208_v3 = vld [vmem:[%s7181_s12 + $0xe0] ss:$16 sps:$4 sm:$0xff]  }
 0x34e   :  { %2055 = vmatmul.mubr.bf16.vlgmr.msra.gmra.mrb[12].mxu1 %v6311_v52 }
 0x34f   :  { %2273 = vmatpush1.bf16.msra.mxu1 %v5118_v4  ;;  %2304 = vmatprep.mubr.bf16.mxu1 %v1711_v39  ;;  %v5181_v39 = vld [vmem:[%s7181_s12 + $0x48] ss:$16 sps:$4 sm:$0xff]   ;;  %v5210_v4 = vld [vmem:[%s7181_s12 + $0xe4] ss:$16 sps:$4 sm:$0xff]  }
 0x350   :  { %2274 = vmatprep.subr.bf16.mxu1 %v5123_v5  ;;  %v5213_v5 = vld [vmem:[%s7181_s12 + $0xec] ss:$16 sps:$4 sm:$0xff]   ;;  %2735 = vmatprep.subr.bf16.mxu0 %v5210_v4 }
 0x351   :  { %2736 = vmatpush1.bf16.msra.mxu0 %v5208_v3 }
 0x353   :  { %2275 = vmatpush1.bf16.msra.mxu1 %v5121_v6  ;;  %v5216_v6 = vld [vmem:[%s7181_s12 + $0x104] ss:$16 sps:$4 sm:$0xff]  }
 0x354   :  { %2276 = vmatprep.subr.bf16.mxu1 %v5126_v7  ;;  %v5211_v7 = vld [vmem:[%s7181_s12 + $0xe8] ss:$16 sps:$4 sm:$0xff]   ;;  %2737 = vmatprep.subr.bf16.mxu0 %v5216_v6 }
 0x357   :  { %2277 = vmatpush1.bf16.msra.mxu1 %v5124_v8  ;;  %v5219_v8 = vld [vmem:[%s7181_s12 + $0x10c] ss:$16 sps:$4 sm:$0xff]  }
 0x358   :  { %2278 = vmatprep.subr.bf16.mxu1 %v5129_v9  ;;  %v5214_v9 = vld [vmem:[%s7181_s12 + $0x100] ss:$16 sps:$4 sm:$0xff]  }
 0x359   :  { %2738 = vmatpush1.bf16.msra.mxu0 %v5214_v9 }
 0x35b   :  { %2279 = vmatpush1.bf16.msra.mxu1 %v5127_v10  ;;  %v5222_v10 = vld [vmem:[%s7181_s12 + $0x124] ss:$16 sps:$4 sm:$0xff]  }
 0x35c   :  { %2280 = vmatprep.subr.bf16.mxu1 %v5132_v11  ;;  %v5217_v11 = vld [vmem:[%s7181_s12 + $0x108] ss:$16 sps:$4 sm:$0xff]   ;;  %2739 = vmatprep.subr.bf16.mxu0 %v5222_v10  ;;  %v5270_v10 = vld [vmem:[%s7185_s14 + $0x24] ss:$16 sps:$4 sm:$0xff]  }
 0x35f   :  { %2281 = vmatpush1.bf16.msra.mxu1 %v5130_v12  ;;  %v5225_v12 = vld [vmem:[%s7181_s12 + $0x12c] ss:$16 sps:$4 sm:$0xff]  }
 0x360   :  { %2282 = vmatprep.subr.bf16.mxu1 %v5135_v13  ;;  %v5220_v13 = vld [vmem:[%s7181_s12 + $0x120] ss:$16 sps:$4 sm:$0xff]  }
 0x361   :  { %2740 = vmatpush1.bf16.msra.mxu0 %v5220_v13 }
 0x363   :  { %2283 = vmatpush1.bf16.msra.mxu1 %v5133_v14  ;;  %v5228_v14 = vld [vmem:[%s7181_s12 + $0x144] ss:$16 sps:$4 sm:$0xff]  }
 0x364   :  { %2284 = vmatprep.subr.bf16.mxu1 %v5138_v15  ;;  %v5223_v15 = vld [vmem:[%s7181_s12 + $0x128] ss:$16 sps:$4 sm:$0xff]   ;;  %2741 = vmatprep.subr.bf16.mxu0 %v5228_v14  ;;  %v5268_v14 = vld [vmem:[%s7185_s14 + $0x20] ss:$16 sps:$4 sm:$0xff]  }
 0x367   :  { %2285 = vmatpush1.bf16.msra.mxu1 %v5136_v16  ;;  %v5231_v16 = vld [vmem:[%s7181_s12 + $0x14c] ss:$16 sps:$4 sm:$0xff]  }
 0x368   :  { %2286 = vmatprep.subr.bf16.mxu1 %v5141_v17  ;;  %v5226_v17 = vld [vmem:[%s7181_s12 + $0x140] ss:$16 sps:$4 sm:$0xff]  }
 0x369   :  { %2742 = vmatpush1.bf16.msra.mxu0 %v5226_v17  ;;  %v5279_v17 = vld [vmem:[%s7185_s14 + $0x4c] ss:$16 sps:$4 sm:$0xff]  }
 0x36b   :  { %2287 = vmatpush1.bf16.msra.mxu1 %v5139_v18  ;;  %v5234_v18 = vld [vmem:[%s7181_s12 + $0x164] ss:$16 sps:$4 sm:$0xff]  }
 0x36c   :  { %2288 = vmatprep.subr.bf16.mxu1 %v5144_v19  ;;  %v5229_v19 = vld [vmem:[%s7181_s12 + $0x148] ss:$16 sps:$4 sm:$0xff]   ;;  %2743 = vmatprep.subr.bf16.mxu0 %v5234_v18  ;;  %v5274_v18 = vld [vmem:[%s7185_s14 + $0x40] ss:$16 sps:$4 sm:$0xff]  }
 0x36f   :  { %2289 = vmatpush1.bf16.msra.mxu1 %v5142_v20  ;;  %v5237_v20 = vld [vmem:[%s7181_s12 + $0x16c] ss:$16 sps:$4 sm:$0xff]  }
 0x370   :  { %2290 = vmatprep.subr.bf16.mxu1 %v5147_v25  ;;  %v5232_v25 = vld [vmem:[%s7181_s12 + $0x160] ss:$16 sps:$4 sm:$0xff]  }
 0x371   :  { %2744 = vmatpush1.bf16.msra.mxu0 %v5232_v25  ;;  %v5285_v25 = vld [vmem:[%s7185_s14 + $0x6c] ss:$16 sps:$4 sm:$0xff]  }
 0x373   :  { %2291 = vmatpush1.bf16.msra.mxu1 %v5145_v26  ;;  %v5240_v26 = vld [vmem:[%s7181_s12 + $0x184] ss:$16 sps:$4 sm:$0xff]  }
 0x374   :  { %2292 = vmatprep.subr.bf16.mxu1 %v5150_v27  ;;  %v5235_v27 = vld [vmem:[%s7181_s12 + $0x168] ss:$16 sps:$4 sm:$0xff]   ;;  %2745 = vmatprep.subr.bf16.mxu0 %v5240_v26  ;;  %v5280_v26 = vld [vmem:[%s7185_s14 + $0x60] ss:$16 sps:$4 sm:$0xff]  }
 0x377   :  { %2293 = vmatpush1.bf16.msra.mxu1 %v5148_v29  ;;  %v5243_v29 = vld [vmem:[%s7181_s12 + $0x18c] ss:$16 sps:$4 sm:$0xff]  }
 0x378   :  { %2294 = vmatprep.subr.bf16.mxu1 %v5153_v30  ;;  %v5238_v30 = vld [vmem:[%s7181_s12 + $0x180] ss:$16 sps:$4 sm:$0xff]  }
 0x379   :  { %2746 = vmatpush1.bf16.msra.mxu0 %v5238_v30  ;;  %v5291_v30 = vld [vmem:[%s7185_s14 + $0x8c] ss:$16 sps:$4 sm:$0xff]  }
 0x37b   :  { %2295 = vmatpush1.bf16.msra.mxu1 %v5151_v31  ;;  %v5246_v31 = vld [vmem:[%s7181_s12 + $0x1a4] ss:$16 sps:$4 sm:$0xff]  }
 0x37c   :  { %2296 = vmatprep.subr.bf16.mxu1 %v5156_v32  ;;  %v5241_v32 = vld [vmem:[%s7181_s12 + $0x188] ss:$16 sps:$4 sm:$0xff]   ;;  %2747 = vmatprep.subr.bf16.mxu0 %v5246_v31  ;;  %v5286_v31 = vld [vmem:[%s7185_s14 + $0x80] ss:$16 sps:$4 sm:$0xff]  }
 0x37f   :  { %2297 = vmatpush1.bf16.msra.mxu1 %v5154_v33  ;;  %v5249_v33 = vld [vmem:[%s7181_s12 + $0x1ac] ss:$16 sps:$4 sm:$0xff]  }
 0x380   :  { %2298 = vmatprep.subr.bf16.mxu1 %v5159_v34  ;;  %v5244_v34 = vld [vmem:[%s7181_s12 + $0x1a0] ss:$16 sps:$4 sm:$0xff]  }
 0x381   :  { %2748 = vmatpush1.bf16.msra.mxu0 %v5244_v34  ;;  %v5297_v34 = vld [vmem:[%s7185_s14 + $0xac] ss:$16 sps:$4 sm:$0xff]  }
 0x383   :  { %2299 = vmatpush1.bf16.msra.mxu1 %v5157_v35  ;;  %v5252_v35 = vld [vmem:[%s7181_s12 + $0x1c4] ss:$16 sps:$4 sm:$0xff]  }
 0x384   :  { %2300 = vmatprep.subr.bf16.mxu1 %v5162_v36  ;;  %v5247_v36 = vld [vmem:[%s7181_s12 + $0x1a8] ss:$16 sps:$4 sm:$0xff]   ;;  %2749 = vmatprep.subr.bf16.mxu0 %v5252_v35  ;;  %v5292_v35 = vld [vmem:[%s7185_s14 + $0xa0] ss:$16 sps:$4 sm:$0xff]  }
 0x387   :  { %2301 = vmatpush1.bf16.msra.mxu1 %v5160_v37  ;;  %v5255_v37 = vld [vmem:[%s7181_s12 + $0x1cc] ss:$16 sps:$4 sm:$0xff]  }
 0x388   :  { %2302 = vmatprep.subr.bf16.mxu1 %v5165_v40  ;;  %v5250_v40 = vld [vmem:[%s7181_s12 + $0x1c0] ss:$16 sps:$4 sm:$0xff]  }
 0x389   :  { %2750 = vmatpush1.bf16.msra.mxu0 %v5250_v40  ;;  %v5303_v40 = vld [vmem:[%s7185_s14 + $0xcc] ss:$16 sps:$4 sm:$0xff]  }
 0x38a   :  { %2751 = vmatprep.subr.bf16.mxu0 %v5258_v42  ;;  %v5301_v42 = vld [vmem:[%s7185_s14 + $0xc8] ss:$16 sps:$4 sm:$0xff]  }
 0x38b   :  { %2303 = vmatpush1.bf16.msra.mxu1 %v5163_v41  ;;  %v5253_v41 = vld [vmem:[%s7181_s12 + $0x1c8] ss:$16 sps:$4 sm:$0xff]  }
 0x38c   :  { %2762 = vmatprep.subr.bf16.mxu1 %v5171_v44  ;;  %v5259_v44 = vld [vmem:[%s7181_s12 + $0x1e8] ss:$16 sps:$4 sm:$0xff]  }
 0x38e   :  { %2305 = vmatmul.mubr.bf16.vlgmr.msra.gmra.mrb[16].mxu1 %v6311_v52  ;;  %v5189_v52 = vld [vmem:[%s7181_s12 + $0x6c] ss:$16 sps:$4 sm:$0xff]  }
 0x38f   :  { %2763 = vmatpush1.bf16.msra.mxu1 %v5169_v43  ;;  %v5256_v43 = vld [vmem:[%s7181_s12 + $0x1e0] ss:$16 sps:$4 sm:$0xff]  }
 0x390   :  { %2764 = vmatprep.subr.bf16.mxu1 %v5177_v46  ;;  %2752 = vmatpush1.bf16.msra.mxu0 %v5256_v43  ;;  %v4364_v46 = vld [vmem:[%s7182_s7] ss:$0 sm:$0xff]  ;;  %v5309_v43 = vld [vmem:[%s7185_s14 + $0xec] ss:$16 sps:$4 sm:$0xff]  }
 0x393   :  { %2765 = vmatpush1.bf16.msra.mxu1 %v5175_v47 }
 0x394   :  { %2766 = vmatprep.subr.bf16.mxu1 %v5183_v49 }
 0x397   :  { %2767 = vmatpush1.bf16.msra.mxu1 %v5181_v39 }
 0x398   :  { %2768 = vmatprep.subr.bf16.mxu1 %v5189_v52 }
 0x39b   :  { %2769 = vmatpush1.bf16.msra.mxu1 %v5187_v54 }
 0x39c   :  { %2770 = vmatprep.subr.bf16.mxu1 %v5195_v58 }
 0x39f   :  { %2771 = vmatpush1.bf16.msra.mxu1 %v5193_v57 }
 0x3a0   :  { %2772 = vmatprep.subr.bf16.mxu1 %v5201_v60  ;;  %v5264_v60 = vld [vmem:[%s7185_s14 + $0x4] ss:$16 sps:$4 sm:$0xff]  }
 0x3a1   :  { %3609 = vmatprep.subr.bf16.mxu0 %v5264_v60  ;;  %v5336_v60 = vld [vmem:[%s7185_s14 + $0x184] ss:$16 sps:$4 sm:$0xff]  }
 0x3a3   :  { %2773 = vmatpush1.bf16.msra.mxu1 %v5199_v62 }
 0x3a4   :  { %2774 = vmatprep.subr.bf16.mxu1 %v5207_v0  ;;  %v2105_v0 = vrot.slane %v2100_v63, %v5842_v22  ;;  %v5337_v63 = vld [vmem:[%s7185_s14 + $0x188] ss:$16 sps:$4 sm:$0xff]  }
 0x3a7   :  { %2775 = vmatpush1.bf16.msra.mxu1 %v5205_v2 }
 0x3a8   :  { %2776 = vmatprep.subr.bf16.mxu1 %v5213_v5 }
 0x3ab   :  { %2777 = vmatpush1.bf16.msra.mxu1 %v5211_v7  ;;  %v5262_v7 = vld [vmem:[%s7185_s14] ss:$16 sps:$4 sm:$0xff]  }
 0x3ac   :  { %2778 = vmatprep.subr.bf16.mxu1 %v5219_v8  ;;  %v5265_v8 = vld [vmem:[%s7185_s14 + $0x8] ss:$16 sps:$4 sm:$0xff]  }
 0x3af   :  { %2779 = vmatpush1.bf16.msra.mxu1 %v5217_v11  ;;  %v5273_v11 = vld [vmem:[%s7185_s14 + $0x2c] ss:$16 sps:$4 sm:$0xff]  }
 0x3b0   :  { %2780 = vmatprep.subr.bf16.mxu1 %v5225_v12 }
 0x3b3   :  { %2781 = vmatpush1.bf16.msra.mxu1 %v5223_v15  ;;  %v5271_v15 = vld [vmem:[%s7185_s14 + $0x28] ss:$16 sps:$4 sm:$0xff]  }
 0x3b4   :  { %2782 = vmatprep.subr.bf16.mxu1 %v5231_v16  ;;  %v5276_v16 = vld [vmem:[%s7185_s14 + $0x44] ss:$16 sps:$4 sm:$0xff]  }
 0x3b7   :  { %2783 = vmatpush1.bf16.msra.mxu1 %v5229_v19  ;;  %v5277_v19 = vld [vmem:[%s7185_s14 + $0x48] ss:$16 sps:$4 sm:$0xff]  }
 0x3b8   :  { %2784 = vmatprep.subr.bf16.mxu1 %v5237_v20  ;;  %v5282_v20 = vld [vmem:[%s7185_s14 + $0x64] ss:$16 sps:$4 sm:$0xff]  }
 0x3bb   :  { %2785 = vmatpush1.bf16.msra.mxu1 %v5235_v27  ;;  %v5283_v27 = vld [vmem:[%s7185_s14 + $0x68] ss:$16 sps:$4 sm:$0xff]  }
 0x3bc   :  { %2786 = vmatprep.subr.bf16.mxu1 %v5243_v29  ;;  %v5288_v29 = vld [vmem:[%s7185_s14 + $0x84] ss:$16 sps:$4 sm:$0xff]  }
 0x3bf   :  { %2787 = vmatpush1.bf16.msra.mxu1 %v5241_v32  ;;  %v5289_v32 = vld [vmem:[%s7185_s14 + $0x88] ss:$16 sps:$4 sm:$0xff]  }
 0x3c0   :  { %2788 = vmatprep.subr.bf16.mxu1 %v5249_v33  ;;  %v5294_v33 = vld [vmem:[%s7185_s14 + $0xa4] ss:$16 sps:$4 sm:$0xff]  }
 0x3c3   :  { %2789 = vmatpush1.bf16.msra.mxu1 %v5247_v36  ;;  %v5295_v36 = vld [vmem:[%s7185_s14 + $0xa8] ss:$16 sps:$4 sm:$0xff]  }
 0x3c4   :  { %2790 = vmatprep.subr.bf16.mxu1 %v5255_v37  ;;  %v5300_v37 = vld [vmem:[%s7185_s14 + $0xc4] ss:$16 sps:$4 sm:$0xff]  }
 0x3c7   :  { %2791 = vmatpush1.bf16.msra.mxu1 %v5253_v41  ;;  %v5298_v41 = vld [vmem:[%s7185_s14 + $0xc0] ss:$16 sps:$4 sm:$0xff]  }
 0x3c8   :  { %2792 = vmatprep.subr.bf16.mxu1 %v5261_v21  ;;  %v5306_v21 = vld [vmem:[%s7185_s14 + $0xe4] ss:$16 sps:$4 sm:$0xff]  }
 0x3cb   :  { %2793 = vmatpush1.bf16.msra.mxu1 %v5259_v44  ;;  %v5304_v44 = vld [vmem:[%s7185_s14 + $0xe0] ss:$16 sps:$4 sm:$0xff]  }
 0x3cc   :  { %3691 = vmatprep.subr.bf16.mxu1 %v5267_v61  ;;  %v5339_v61 = vld [vmem:[%s7185_s14 + $0x18c] ss:$16 sps:$4 sm:$0xff]  }
 0x401   :  { %v4672_v45 = vpop.f32.mrb[8].mxu1 }
 0x402   :  { %v4673_v23 = vpop.f32.mrb[9].mxu1 }
 0x403   :  { %v4674_v47 = vadd.f32 %v4673_v23, %v4672_v45  ;;  %v4675_v48 = vpop.f32.mrb[10].mxu1  ;;  %v5307_v45 = vld [vmem:[%s7185_s14 + $0xe8] ss:$16 sps:$4 sm:$0xff]   ;;  %v5315_v23 = vld [vmem:[%s7185_s14 + $0x10c] ss:$16 sps:$4 sm:$0xff]  }
 0x404   :  { %v4676_v49 = vpop.f32.mrb[11].mxu1  ;;  %v5313_v48 = vld [vmem:[%s7185_s14 + $0x108] ss:$16 sps:$4 sm:$0xff]  }
 0x405   :  { %v1882_v50 = vadd.f32 %v4674_v47, %v4364_v46  ;;  %v5312_v46 = vld [vmem:[%s7185_s14 + $0x104] ss:$16 sps:$4 sm:$0xff]   ;;  %v5310_v47 = vld [vmem:[%s7185_s14 + $0x100] ss:$16 sps:$4 sm:$0xff]  }
 0x406   :  { %v5318_v49 = vld [vmem:[%s7185_s14 + $0x124] ss:$16 sps:$4 sm:$0xff]  }
 0x407   :  { %4135 = vst.msk [vmem:[%s7183_s17] sm:$0xff] %vm4134_vm11, %v1882_v50  ;;  %v5321_v50 = vld [vmem:[%s7185_s14 + $0x12c] ss:$16 sps:$4 sm:$0xff]  }
 0x421   :  { %v4694_v39 = vpop.f32.mrb[12].mxu1 }
 0x422   :  { %v4695_v52 = vpop.f32.mrb[13].mxu1 }
 0x423   :  { %v4696_v53 = vadd.f32 %v4695_v52, %v4694_v39  ;;  %v4697_v54 = vpop.f32.mrb[14].mxu1  ;;  %v5316_v39 = vld [vmem:[%s7185_s14 + $0x120] ss:$16 sps:$4 sm:$0xff]   ;;  %v5324_v52 = vld [vmem:[%s7185_s14 + $0x144] ss:$16 sps:$4 sm:$0xff]  }
 0x424   :  { %v4698_v55 = vpop.f32.mrb[15].mxu1  ;;  %v5322_v54 = vld [vmem:[%s7185_s14 + $0x140] ss:$16 sps:$4 sm:$0xff]  }
 0x425   :  { %v2057_v56 = vadd.f32 %v4696_v53, %v4381_v51  ;;  %v5319_v51 = vld [vmem:[%s7185_s14 + $0x128] ss:$16 sps:$4 sm:$0xff]   ;;  %v5327_v53 = vld [vmem:[%s7185_s14 + $0x14c] ss:$16 sps:$4 sm:$0xff]  }
 0x426   :  { %v5325_v55 = vld [vmem:[%s7185_s14 + $0x148] ss:$16 sps:$4 sm:$0xff]  }
 0x427   :  { %v4398_v57 = vmul.f32 -1.442695, %v2057_v56  ;;  %v5330_v56 = vld [vmem:[%s7185_s14 + $0x164] ss:$16 sps:$4 sm:$0xff]  }
 0x429   :  { %5486 = vpow2.f32 %v4398_v57  ;;  %v5333_v57 = vld [vmem:[%s7185_s14 + $0x16c] ss:$16 sps:$4 sm:$0xff]  }
 0x433   :  { %v5487_v58 = vpop.eup %5486 }
 0x434   :  { %v2065_v59 = vadd.f32 1.0, %v5487_v58  ;;  %v5328_v58 = vld [vmem:[%s7185_s14 + $0x160] ss:$16 sps:$4 sm:$0xff]  }
 0x436   :  { %5488 = vrcp.f32 %v2065_v59  ;;  %v5331_v59 = vld [vmem:[%s7185_s14 + $0x168] ss:$16 sps:$4 sm:$0xff]  }
 0x440   :  { %v5489_v62 = vpop.eup %5488 }
 0x441   :  { %4137 = vrot.lane.b32.xlu0 %v5489_v62, %s5495_s9  ;;  %v5334_v62 = vld [vmem:[%s7185_s14 + $0x180] ss:$16 sps:$4 sm:$0xff]  }
 0x461   :  { %v2306_v2 = vpop.f32.mrb[16].mxu1 }
 0x462   :  { %v2307_v3 = vadd.f32 %v2306_v2, %v2105_v0  ;;  %v2308_v4 = vpop.f32.mrb[17].mxu1  ;;  %v5342_v0 = vld [vmem:[%s7185_s14 + $0x1a4] ss:$16 sps:$4 sm:$0xff]   ;;  %v5340_v2 = vld [vmem:[%s7185_s14 + $0x1a0] ss:$16 sps:$4 sm:$0xff]  }
 0x463   :  { %v2309_v5 = vadd.f32 %v2308_v4, %v2109_v1  ;;  %v2310_v6 = vpop.f32.mrb[18].mxu1  ;;  %v5345_v1 = vld [vmem:[%s7185_s14 + $0x1ac] ss:$16 sps:$4 sm:$0xff]  }
 0x464   :  { %v2311_v9 = vpop.f32.mrb[19].mxu1  ;;  %v2313_v13 = vpack.c.bf16 %v2307_v3, %v2307_v3  ;;  %v5343_v3 = vld [vmem:[%s7185_s14 + $0x1a8] ss:$16 sps:$4 sm:$0xff]   ;;  %v5351_v6 = vld [vmem:[%s7185_s14 + $0x1cc] ss:$16 sps:$4 sm:$0xff]  }
 0x465   :  { %v2314_v12 = vpack.c.bf16 %v2309_v5, %v2309_v5  ;;  %v5348_v5 = vld [vmem:[%s7185_s14 + $0x1c4] ss:$16 sps:$4 sm:$0xff]  }
 0x466   :  { %v5354_v9 = vld [vmem:[%s7185_s14 + $0x1e4] ss:$16 sps:$4 sm:$0xff]  }
 0x467   :  { %2753 = vmatprep.mubr.bf16.mxu0 %v2314_v12  ;;  %2794 = vmatprep.mubr.bf16.mxu1 %v2314_v12  ;;  %v5355_v12 = vld [vmem:[%s7185_s14 + $0x1e8] ss:$16 sps:$4 sm:$0xff]  }
 0x468   :  { %2754 = vmatmul.mubr.bf16.vlgmr.msra.gmra.mrb[12].mxu0 %v2313_v13  ;;  %2795 = vmatmul.mubr.bf16.vlgmr.msra.gmra.mrb[20].mxu1 %v2313_v13  ;;  %v5360_v13 = vld [vmem:[%s7185_s14 + $0x204] ss:$16 sps:$4 sm:$0xff]  }
 0x469   :  { %3610 = vmatpush1.bf16.msra.mxu0 %v5262_v7  ;;  %3692 = vmatpush1.bf16.msra.mxu1 %v5265_v8  ;;  %v5346_v7 = vld [vmem:[%s7185_s14 + $0x1c0] ss:$16 sps:$4 sm:$0xff]   ;;  %v5349_v8 = vld [vmem:[%s7185_s14 + $0x1c8] ss:$16 sps:$4 sm:$0xff]  }
 0x46a   :  { %3611 = vmatprep.subr.bf16.mxu0 %v5270_v10  ;;  %3693 = vmatprep.subr.bf16.mxu1 %v5273_v11  ;;  %v5357_v10 = vld [vmem:[%s7185_s14 + $0x1ec] ss:$16 sps:$4 sm:$0xff]   ;;  %v5352_v11 = vld [vmem:[%s7185_s14 + $0x1e0] ss:$16 sps:$4 sm:$0xff]  }
 0x46d   :  { %3612 = vmatpush1.bf16.msra.mxu0 %v5268_v14  ;;  %3694 = vmatpush1.bf16.msra.mxu1 %v5271_v15  ;;  %v5363_v14 = vld [vmem:[%s7185_s14 + $0x20c] ss:$16 sps:$4 sm:$0xff]   ;;  %v6864_v15 = vld [vmem:[%s7188_s13] sm:$0xf] }
 0x46e   :  { %3613 = vmatprep.subr.bf16.mxu0 %v5276_v16  ;;  %3695 = vmatprep.subr.bf16.mxu1 %v5279_v17  ;;  %v2384_v16 = vrot.slane %v6864_v15, %v5842_v22  ;;  %v2388_v17 = vrot.slane %v6864_v15, %v5850_v24 }
 0x471   :  { %3614 = vmatpush1.bf16.msra.mxu0 %v5274_v18  ;;  %3696 = vmatpush1.bf16.msra.mxu1 %v5277_v19  ;;  %v2396_v18 = vrot.slane %v6864_v15, %v5857_v28 }
 0x472   :  { %3615 = vmatprep.subr.bf16.mxu0 %v5282_v20  ;;  %3697 = vmatprep.subr.bf16.mxu1 %v5285_v25 }
 0x475   :  { %3616 = vmatpush1.bf16.msra.mxu0 %v5280_v26  ;;  %3698 = vmatpush1.bf16.msra.mxu1 %v5283_v27 }
 0x476   :  { %3617 = vmatprep.subr.bf16.mxu0 %v5288_v29  ;;  %3699 = vmatprep.subr.bf16.mxu1 %v5291_v30 }
 0x479   :  { %3618 = vmatpush1.bf16.msra.mxu0 %v5286_v31  ;;  %3700 = vmatpush1.bf16.msra.mxu1 %v5289_v32 }
 0x47a   :  { %3619 = vmatprep.subr.bf16.mxu0 %v5294_v33  ;;  %3701 = vmatprep.subr.bf16.mxu1 %v5297_v34 }
 0x47d   :  { %3620 = vmatpush1.bf16.msra.mxu0 %v5292_v35  ;;  %3702 = vmatpush1.bf16.msra.mxu1 %v5295_v36 }
 0x47e   :  { %3621 = vmatprep.subr.bf16.mxu0 %v5300_v37  ;;  %3703 = vmatprep.subr.bf16.mxu1 %v5303_v40 }
 0x481   :  { %3622 = vmatpush1.bf16.msra.mxu0 %v5298_v41  ;;  %3704 = vmatpush1.bf16.msra.mxu1 %v5301_v42 }
 0x482   :  { %3623 = vmatprep.subr.bf16.mxu0 %v5306_v21  ;;  %3705 = vmatprep.subr.bf16.mxu1 %v5309_v43  ;;  %v5358_v21 = vld [vmem:[%s7185_s14 + $0x200] ss:$16 sps:$4 sm:$0xff]   ;;  %v5361_v43 = vld [vmem:[%s7185_s14 + $0x208] ss:$16 sps:$4 sm:$0xff]  }
 0x485   :  { %3624 = vmatpush1.bf16.msra.mxu0 %v5304_v44  ;;  %3706 = vmatpush1.bf16.msra.mxu1 %v5307_v45 }
 0x486   :  { %3625 = vmatprep.subr.bf16.mxu0 %v5312_v46  ;;  %3707 = vmatprep.subr.bf16.mxu1 %v5315_v23  ;;  %v5366_v46 = vld [vmem:[%s7185_s14 + $0x224] ss:$16 sps:$4 sm:$0xff]   ;;  %v5369_v23 = vld [vmem:[%s7185_s14 + $0x22c] ss:$16 sps:$4 sm:$0xff]  }
 0x489   :  { %3626 = vmatpush1.bf16.msra.mxu0 %v5310_v47  ;;  %3708 = vmatpush1.bf16.msra.mxu1 %v5313_v48  ;;  %v5364_v48 = vld [vmem:[%s7185_s14 + $0x220] ss:$16 sps:$4 sm:$0xff]  }
 0x48a   :  { %3627 = vmatprep.subr.bf16.mxu0 %v5318_v49  ;;  %3709 = vmatprep.subr.bf16.mxu1 %v5321_v50  ;;  %v5367_v49 = vld [vmem:[%s7185_s14 + $0x228] ss:$16 sps:$4 sm:$0xff]   ;;  %v5372_v50 = vld [vmem:[%s7185_s14 + $0x244] ss:$16 sps:$4 sm:$0xff]  }
 0x48d   :  { %3628 = vmatpush1.bf16.msra.mxu0 %v5316_v39  ;;  %3710 = vmatpush1.bf16.msra.mxu1 %v5319_v51  ;;  %v5375_v39 = vld [vmem:[%s7185_s14 + $0x24c] ss:$16 sps:$4 sm:$0xff]   ;;  %v5370_v51 = vld [vmem:[%s7185_s14 + $0x240] ss:$16 sps:$4 sm:$0xff]  }
 0x48e   :  { %3629 = vmatprep.subr.bf16.mxu0 %v5324_v52  ;;  %3711 = vmatprep.subr.bf16.mxu1 %v5327_v53  ;;  %v5373_v52 = vld [vmem:[%s7185_s14 + $0x248] ss:$16 sps:$4 sm:$0xff]   ;;  %v5378_v53 = vld [vmem:[%s7185_s14 + $0x264] ss:$16 sps:$4 sm:$0xff]  }
 0x491   :  { %3630 = vmatpush1.bf16.msra.mxu0 %v5322_v54  ;;  %3712 = vmatpush1.bf16.msra.mxu1 %v5325_v55  ;;  %v5381_v54 = vld [vmem:[%s7185_s14 + $0x26c] ss:$16 sps:$4 sm:$0xff]   ;;  %v5376_v55 = vld [vmem:[%s7185_s14 + $0x260] ss:$16 sps:$4 sm:$0xff]  }
 0x492   :  { %3631 = vmatprep.subr.bf16.mxu0 %v5330_v56  ;;  %3713 = vmatprep.subr.bf16.mxu1 %v5333_v57  ;;  %v5379_v56 = vld [vmem:[%s7185_s14 + $0x268] ss:$16 sps:$4 sm:$0xff]   ;;  %v5384_v57 = vld [vmem:[%s7185_s14 + $0x284] ss:$16 sps:$4 sm:$0xff]  }
 0x495   :  { %3632 = vmatpush1.bf16.msra.mxu0 %v5328_v58  ;;  %3714 = vmatpush1.bf16.msra.mxu1 %v5331_v59  ;;  %v5387_v58 = vld [vmem:[%s7185_s14 + $0x28c] ss:$16 sps:$4 sm:$0xff]   ;;  %v5382_v59 = vld [vmem:[%s7185_s14 + $0x280] ss:$16 sps:$4 sm:$0xff]  }
 0x496   :  { %3633 = vmatprep.subr.bf16.mxu0 %v5336_v60  ;;  %3715 = vmatprep.subr.bf16.mxu1 %v5339_v61  ;;  %v5385_v60 = vld [vmem:[%s7185_s14 + $0x288] ss:$16 sps:$4 sm:$0xff]   ;;  %v5390_v61 = vld [vmem:[%s7185_s14 + $0x2a4] ss:$16 sps:$4 sm:$0xff]  }
 0x499   :  { %3634 = vmatpush1.bf16.msra.mxu0 %v5334_v62  ;;  %3716 = vmatpush1.bf16.msra.mxu1 %v5337_v63  ;;  %v5393_v62 = vld [vmem:[%s7185_s14 + $0x2ac] ss:$16 sps:$4 sm:$0xff]   ;;  %v5388_v63 = vld [vmem:[%s7185_s14 + $0x2a0] ss:$16 sps:$4 sm:$0xff]  }
 0x49a   :  { %3635 = vmatprep.subr.bf16.mxu0 %v5342_v0  ;;  %3717 = vmatprep.subr.bf16.mxu1 %v5345_v1  ;;  %v5391_v0 = vld [vmem:[%s7185_s14 + $0x2a8] ss:$16 sps:$4 sm:$0xff]   ;;  %v5396_v1 = vld [vmem:[%s7185_s14 + $0x2c4] ss:$16 sps:$4 sm:$0xff]  }
 0x49d   :  { %3636 = vmatpush1.bf16.msra.mxu0 %v5340_v2  ;;  %3718 = vmatpush1.bf16.msra.mxu1 %v5343_v3  ;;  %v5399_v2 = vld [vmem:[%s7185_s14 + $0x2cc] ss:$16 sps:$4 sm:$0xff]   ;;  %v5394_v3 = vld [vmem:[%s7185_s14 + $0x2c0] ss:$16 sps:$4 sm:$0xff]  }
 0x49e   :  { %3637 = vmatprep.subr.bf16.mxu0 %v5348_v5  ;;  %3719 = vmatprep.subr.bf16.mxu1 %v5351_v6  ;;  %v5402_v5 = vld [vmem:[%s7185_s14 + $0x2e4] ss:$16 sps:$4 sm:$0xff]   ;;  %v5405_v6 = vld [vmem:[%s7185_s14 + $0x2ec] ss:$16 sps:$4 sm:$0xff]  }
 0x4a1   :  { %3638 = vmatpush1.bf16.msra.mxu0 %v5346_v7  ;;  %3720 = vmatpush1.bf16.msra.mxu1 %v5349_v8  ;;  %v5400_v7 = vld [vmem:[%s7185_s14 + $0x2e0] ss:$16 sps:$4 sm:$0xff]   ;;  %v5403_v8 = vld [vmem:[%s7185_s14 + $0x2e8] ss:$16 sps:$4 sm:$0xff]  }
 0x4a2   :  { %3639 = vmatprep.subr.bf16.mxu0 %v5354_v9  ;;  %3721 = vmatprep.subr.bf16.mxu1 %v5357_v10  ;;  %v5408_v9 = vld [vmem:[%s7185_s14 + $0x304] ss:$16 sps:$4 sm:$0xff]   ;;  %v5411_v10 = vld [vmem:[%s7185_s14 + $0x30c] ss:$16 sps:$4 sm:$0xff]  }
 0x4a5   :  { %3640 = vmatpush1.bf16.msra.mxu0 %v5352_v11  ;;  %3722 = vmatpush1.bf16.msra.mxu1 %v5355_v12  ;;  %v5406_v11 = vld [vmem:[%s7185_s14 + $0x300] ss:$16 sps:$4 sm:$0xff]   ;;  %v5409_v12 = vld [vmem:[%s7185_s14 + $0x308] ss:$16 sps:$4 sm:$0xff]  }
 0x4a6   :  { %3650 = vmatprep.subr.bf16.mxu0 %v5360_v13  ;;  %3732 = vmatprep.subr.bf16.mxu1 %v5363_v14  ;;  %v5414_v13 = vld [vmem:[%s7185_s14 + $0x324] ss:$16 sps:$4 sm:$0xff]   ;;  %v5417_v14 = vld [vmem:[%s7185_s14 + $0x32c] ss:$16 sps:$4 sm:$0xff]  }
 0x4b3   :  { %v4138_v4 = vpop.permute.xlu0 %4137 }
 0x4b4   :  { %4141 = vst.msk [vmem:[%s7183_s17] sm:$0xff] %vm4140_vm12, %v4138_v4  ;;  %v5397_v4 = vld [vmem:[%s7185_s14 + $0x2c8] ss:$16 sps:$4 sm:$0xff]  }
 0x53b   :  { %v2755_v19 = vpop.f32.mrb[12].mxu0  ;;  %v6872_v20 = vpop.f32.mrb[20].mxu1 }
 0x53c   :  { %v2756_v25 = vadd.f32 %v2755_v19, %v2384_v16  ;;  %v2757_v26 = vpop.f32.mrb[13].mxu0  ;;  %v2798_v27 = vpop.f32.mrb[21].mxu1  ;;  %v5412_v16 = vld [vmem:[%s7185_s14 + $0x320] ss:$16 sps:$4 sm:$0xff]   ;;  %v5423_v19 = vld [vmem:[%s7185_s14 + $0x34c] ss:$16 sps:$4 sm:$0xff]  }
 0x53d   :  { %v2758_v29 = vadd.f32 %v2757_v26, %v2388_v17  ;;  %v2799_v30 = vadd.f32 %v2798_v27, %v2396_v18  ;;  %v2759_v31 = vpop.f32.mrb[14].mxu0  ;;  %v2800_v32 = vpop.f32.mrb[22].mxu1  ;;  %v5415_v17 = vld [vmem:[%s7185_s14 + $0x328] ss:$16 sps:$4 sm:$0xff]   ;;  %v5420_v18 = vld [vmem:[%s7185_s14 + $0x344] ss:$16 sps:$4 sm:$0xff]  }
 0x53e   :  { %vm2803_vm13 = vcmp.ge.f32.partialorder %v2756_v25, 0.0  ;;  %v2807_v33 = vmul.f32 0.01, %v2756_v25  ;;  %v2760_v37 = vpop.f32.mrb[15].mxu0  ;;  %v2801_v40 = vpop.f32.mrb[23].mxu1 }
 0x53f   :  { %vm2804_vm14 = vcmp.ge.f32.partialorder %v2758_v29, 0.0  ;;  %v2808_v34 = vmul.f32 0.01, %v2758_v29  ;;  %vm2806_vm15 = vcmp.ge.f32.partialorder %v2799_v30, 0.0  ;;  %v2810_v35 = vmul.f32 0.01, %v2799_v30 }
 0x540   :  { %v2811_v36 = vsel %vm2803_vm13, %v2756_v25, %v2807_v33  ;;  %v5418_v25 = vld [vmem:[%s7185_s14 + $0x340] ss:$16 sps:$4 sm:$0xff]   ;;  %v5421_v26 = vld [vmem:[%s7185_s14 + $0x348] ss:$16 sps:$4 sm:$0xff]   ;;  %v5426_v27 = vld [vmem:[%s7185_s14 + $0x364] ss:$16 sps:$4 sm:$0xff]   ;;  %v2392_v40 = vrot.slane %v6864_v15, %v6008_v38 }
 0x541   :  { %v2812_v41 = vsel %vm2804_vm14, %v2758_v29, %v2808_v34  ;;  %v2814_v44 = vsel %vm2806_vm15, %v2799_v30, %v2810_v35  ;;  %v2815_v45 = vpack.c.bf16 %v2811_v36, %v2811_v36  ;;  %v5429_v29 = vld [vmem:[%s7185_s14 + $0x36c] ss:$16 sps:$4 sm:$0xff]   ;;  %v5424_v30 = vld [vmem:[%s7185_s14 + $0x360] ss:$16 sps:$4 sm:$0xff]   ;;  %v5427_v31 = vld [vmem:[%s7185_s14 + $0x368] ss:$16 sps:$4 sm:$0xff]  }
 0x542   :  { %v2816_v42 = vpack.c.bf16 %v2812_v41, %v2812_v41  ;;  %v2818_v47 = vpack.c.bf16 %v2814_v44, %v2814_v44  ;;  %v5432_v32 = vld [vmem:[%s7185_s14 + $0x384] ss:$16 sps:$4 sm:$0xff]   ;;  %v5435_v33 = vld [vmem:[%s7185_s14 + $0x38c] ss:$16 sps:$4 sm:$0xff]   ;;  %v5430_v34 = vld [vmem:[%s7185_s14 + $0x380] ss:$16 sps:$4 sm:$0xff]  }
 0x543   :  { %v5433_v35 = vld [vmem:[%s7185_s14 + $0x388] ss:$16 sps:$4 sm:$0xff]   ;;  %v5438_v36 = vld [vmem:[%s7185_s14 + $0x3a4] ss:$16 sps:$4 sm:$0xff]   ;;  %v5441_v37 = vld [vmem:[%s7185_s14 + $0x3ac] ss:$16 sps:$4 sm:$0xff]  }
 0x544   :  { %3641 = vmatprep.mubr.bf16.mxu0 %v2816_v42  ;;  %3723 = vmatprep.mubr.bf16.mxu1 %v2816_v42  ;;  %v5436_v41 = vld [vmem:[%s7185_s14 + $0x3a0] ss:$16 sps:$4 sm:$0xff]   ;;  %v5439_v42 = vld [vmem:[%s7185_s14 + $0x3a8] ss:$16 sps:$4 sm:$0xff]   ;;  %v5447_v15 = vld [vmem:[%s7185_s14 + $0x3cc] ss:$16 sps:$4 sm:$0xff]  }
 0x545   :  { %3642 = vmatmul.mubr.bf16.vlgmr.msra.gmra.mrb[16].mxu0 %v2815_v45  ;;  %3724 = vmatmul.mubr.bf16.vlgmr.msra.gmra.mrb[24].mxu1 %v2815_v45  ;;  %v5442_v44 = vld [vmem:[%s7185_s14 + $0x3c0] ss:$16 sps:$4 sm:$0xff]   ;;  %v5445_v45 = vld [vmem:[%s7185_s14 + $0x3c8] ss:$16 sps:$4 sm:$0xff]  }
 0x546   :  { %3651 = vmatpush1.bf16.msra.mxu0 %v5358_v21  ;;  %3733 = vmatpush1.bf16.msra.mxu1 %v5361_v43  ;;  %v5444_v21 = vld [vmem:[%s7185_s14 + $0x3c4] ss:$16 sps:$4 sm:$0xff]   ;;  %v2797_v43 = vadd.f32 %v6872_v20, %v2392_v40  ;;  %v5453_v20 = vld [vmem:[%s7185_s14 + $0x3ec] ss:$16 sps:$4 sm:$0xff]  }
 0x547   :  { %3682 = vmatprep.mubr.bf16.mxu0 %v2818_v47  ;;  %3764 = vmatprep.mubr.bf16.mxu1 %v2818_v47  ;;  %v5448_v47 = vld [vmem:[%s7185_s14 + $0x3e0] ss:$16 sps:$4 sm:$0xff]  }
 0x548   :  { %3652 = vmatprep.subr.bf16.mxu0 %v5366_v46  ;;  %3734 = vmatprep.subr.bf16.mxu1 %v5369_v23  ;;  %v5450_v46 = vld [vmem:[%s7185_s14 + $0x3e4] ss:$16 sps:$4 sm:$0xff]   ;;  %v2809_v23 = vmul.f32 0.01, %v2797_v43  ;;  %vm2805_vm0 = vcmp.ge.f32.partialorder %v2797_v43, 0.0 }
 0x54a   :  { %3653 = vmatpush1.bf16.msra.mxu0 %v5364_v48  ;;  %3735 = vmatpush1.bf16.msra.mxu1 %v5367_v49  ;;  %v5451_v48 = vld [vmem:[%s7185_s14 + $0x3e8] ss:$16 sps:$4 sm:$0xff]   ;;  %v5454_v49 = vld [vmem:[%s7187_s16 + $0x40] sm:$0xff]  }
 0x54b   :  { %3654 = vmatprep.subr.bf16.mxu0 %v5372_v50  ;;  %3736 = vmatprep.subr.bf16.mxu1 %v5375_v39  ;;  %v5455_v50 = vld [vmem:[%s7187_s16 + $0xc0] sm:$0xff]   ;;  %v2813_v39 = vsel %vm2805_vm0, %v2797_v43, %v2809_v23 }
 0x54e   :  { %3655 = vmatpush1.bf16.msra.mxu0 %v5370_v51  ;;  %3737 = vmatpush1.bf16.msra.mxu1 %v5373_v52  ;;  %v5456_v51 = vld [vmem:[%s7187_s16] sm:$0xff]  }
 0x54f   :  { %3656 = vmatprep.subr.bf16.mxu0 %v5378_v53  ;;  %3738 = vmatprep.subr.bf16.mxu1 %v5381_v54  ;;  %v5457_v52 = vld [vmem:[%s7187_s16 + $0x80] sm:$0xff]   ;;  %v2817_v53 = vpack.c.bf16 %v2813_v39, %v2813_v39  ;;  %v5458_v54 = vld [vmem:[%s7187_s16 + $0x48] sm:$0xff]  }
 0x552   :  { %3657 = vmatpush1.bf16.msra.mxu0 %v5376_v55  ;;  %3739 = vmatpush1.bf16.msra.mxu1 %v5379_v56  ;;  %v5459_v55 = vld [vmem:[%s7187_s16 + $0xc8] sm:$0xff]  }
 0x553   :  { %3658 = vmatprep.subr.bf16.mxu0 %v5384_v57  ;;  %3740 = vmatprep.subr.bf16.mxu1 %v5387_v58  ;;  %v5460_v56 = vld [vmem:[%s7187_s16 + $0x8] sm:$0xff]   ;;  %v5462_v58 = vld [vmem:[%s7187_s16 + $0x50] sm:$0xff]  }
 0x554   :  { %v5461_v57 = vld [vmem:[%s7187_s16 + $0x88] sm:$0xff]  }
 0x556   :  { %3659 = vmatpush1.bf16.msra.mxu0 %v5382_v59  ;;  %3741 = vmatpush1.bf16.msra.mxu1 %v5385_v60  ;;  %v5463_v59 = vld [vmem:[%s7187_s16 + $0xd0] sm:$0xff]  }
 0x557   :  { %3660 = vmatprep.subr.bf16.mxu0 %v5390_v61  ;;  %3742 = vmatprep.subr.bf16.mxu1 %v5393_v62  ;;  %v5464_v60 = vld [vmem:[%s7187_s16 + $0x10] sm:$0xff]   ;;  %v5466_v62 = vld [vmem:[%s7187_s16 + $0x58] sm:$0xff]  }
 0x558   :  { %v5465_v61 = vld [vmem:[%s7187_s16 + $0x90] sm:$0xff]  }
 0x55a   :  { %3661 = vmatpush1.bf16.msra.mxu0 %v5388_v63  ;;  %3743 = vmatpush1.bf16.msra.mxu1 %v5391_v0  ;;  %v5467_v63 = vld [vmem:[%s7187_s16 + $0xd8] sm:$0xff]  }
 0x55b   :  { %3662 = vmatprep.subr.bf16.mxu0 %v5396_v1  ;;  %3744 = vmatprep.subr.bf16.mxu1 %v5399_v2  ;;  %v5468_v0 = vld [vmem:[%s7187_s16 + $0x18] sm:$0xff]   ;;  %v5470_v2 = vld [vmem:[%s7187_s16 + $0x60] sm:$0xff]  }
 0x55c   :  { %v5469_v1 = vld [vmem:[%s7187_s16 + $0x98] sm:$0xff]  }
 0x55e   :  { %3663 = vmatpush1.bf16.msra.mxu0 %v5394_v3  ;;  %3745 = vmatpush1.bf16.msra.mxu1 %v5397_v4  ;;  %v5471_v3 = vld [vmem:[%s7187_s16 + $0xe0] sm:$0xff]  }
 0x55f   :  { %3664 = vmatprep.subr.bf16.mxu0 %v5402_v5  ;;  %3746 = vmatprep.subr.bf16.mxu1 %v5405_v6  ;;  %v5472_v4 = vld [vmem:[%s7187_s16 + $0x20] sm:$0xff]   ;;  %v5474_v6 = vld [vmem:[%s7187_s16 + $0x68] sm:$0xff]  }
 0x560   :  { %v5473_v5 = vld [vmem:[%s7187_s16 + $0xa0] sm:$0xff]  }
 0x562   :  { %3665 = vmatpush1.bf16.msra.mxu0 %v5400_v7  ;;  %3747 = vmatpush1.bf16.msra.mxu1 %v5403_v8  ;;  %v5475_v7 = vld [vmem:[%s7187_s16 + $0xe8] sm:$0xff]  }
 0x563   :  { %3666 = vmatprep.subr.bf16.mxu0 %v5408_v9  ;;  %3748 = vmatprep.subr.bf16.mxu1 %v5411_v10  ;;  %v5476_v8 = vld [vmem:[%s7187_s16 + $0x28] sm:$0xff]   ;;  %v5478_v10 = vld [vmem:[%s7187_s16 + $0x70] sm:$0xff]  }
 0x564   :  { %v5477_v9 = vld [vmem:[%s7187_s16 + $0xa8] sm:$0xff]  }
 0x566   :  { %3667 = vmatpush1.bf16.msra.mxu0 %v5406_v11  ;;  %3749 = vmatpush1.bf16.msra.mxu1 %v5409_v12  ;;  %v5479_v11 = vld [vmem:[%s7187_s16 + $0xf0] sm:$0xff]  }
 0x567   :  { %3668 = vmatprep.subr.bf16.mxu0 %v5414_v13  ;;  %3750 = vmatprep.subr.bf16.mxu1 %v5417_v14  ;;  %v5480_v12 = vld [vmem:[%s7187_s16 + $0x30] sm:$0xff]   ;;  %v5482_v14 = vld [vmem:[%s7187_s16 + $0x78] sm:$0xff]  }
 0x568   :  { %v5481_v13 = vld [vmem:[%s7187_s16 + $0xb0] sm:$0xff]  }
 0x56a   :  { %3669 = vmatpush1.bf16.msra.mxu0 %v5412_v16  ;;  %3751 = vmatpush1.bf16.msra.mxu1 %v5415_v17  ;;  %v5483_v16 = vld [vmem:[%s7187_s16 + $0xf8] sm:$0xff]  }
 0x56b   :  { %3670 = vmatprep.subr.bf16.mxu0 %v5420_v18  ;;  %3752 = vmatprep.subr.bf16.mxu1 %v5423_v19  ;;  %v5484_v17 = vld [vmem:[%s7187_s16 + $0x38] sm:$0xff]   ;;  %v2947_v19 = vld [vmem:[%s7189_s15] sm:$0xf]  ;;  %s5496_s15 = smov 22  }
 0x56c   :  { %v5485_v18 = vld [vmem:[%s7187_s16 + $0xb8] sm:$0xff]  }
 0x56e   :  { %3671 = vmatpush1.bf16.msra.mxu0 %v5418_v25  ;;  %3753 = vmatpush1.bf16.msra.mxu1 %v5421_v26  ;;  %v2952_v25 = vrot.slane %v2947_v19, %v5842_v22  ;;  %v2960_v26 = vrot.slane %v2947_v19, %v6008_v38 }
 0x56f   :  { %3672 = vmatprep.subr.bf16.mxu0 %v5426_v27  ;;  %3754 = vmatprep.subr.bf16.mxu1 %v5429_v29  ;;  %v2956_v27 = vrot.slane %v2947_v19, %v5850_v24  ;;  %v2964_v29 = vrot.slane %v2947_v19, %v5857_v28 }
 0x572   :  { %3673 = vmatpush1.bf16.msra.mxu0 %v5424_v30  ;;  %3755 = vmatpush1.bf16.msra.mxu1 %v5427_v31 }
 0x573   :  { %3674 = vmatprep.subr.bf16.mxu0 %v5432_v32  ;;  %3756 = vmatprep.subr.bf16.mxu1 %v5435_v33 }
 0x576   :  { %3675 = vmatpush1.bf16.msra.mxu0 %v5430_v34  ;;  %3757 = vmatpush1.bf16.msra.mxu1 %v5433_v35 }
 0x577   :  { %3676 = vmatprep.subr.bf16.mxu0 %v5438_v36  ;;  %3758 = vmatprep.subr.bf16.mxu1 %v5441_v37 }
 0x57a   :  { %3677 = vmatpush1.bf16.msra.mxu0 %v5436_v41  ;;  %3759 = vmatpush1.bf16.msra.mxu1 %v5439_v42 }
 0x57b   :  { %3678 = vmatprep.subr.bf16.mxu0 %v5444_v21  ;;  %3760 = vmatprep.subr.bf16.mxu1 %v5447_v15 }
 0x57e   :  { %3679 = vmatpush1.bf16.msra.mxu0 %v5442_v44  ;;  %3761 = vmatpush1.bf16.msra.mxu1 %v5445_v45 }
 0x57f   :  { %3680 = vmatprep.subr.bf16.mxu0 %v5450_v46  ;;  %3762 = vmatprep.subr.bf16.mxu1 %v5453_v20 }
 0x582   :  { %3681 = vmatpush1.bf16.msra.mxu0 %v5448_v47  ;;  %3763 = vmatpush1.bf16.msra.mxu1 %v5451_v48 }
 0x583   :  { %4700 = vmatprep.subr.bf16.mxu0 %v5454_v49  ;;  %4722 = vmatprep.subr.bf16.mxu1 %v5455_v50 }
 0x585   :  { %3683 = vmatmul.mubr.bf16.vlgmr.msra.gmra.mrb[16].mxu0 %v2817_v53  ;;  %3765 = vmatmul.mubr.bf16.vlgmr.msra.gmra.mrb[24].mxu1 %v2817_v53 }
 0x586   :  { %4701 = vmatpush3.bf16.msra.mxu0 %v5456_v51  ;;  %4723 = vmatpush3.bf16.msra.mxu1 %v5457_v52 }
 0x587   :  { %4702 = vmatprep.subr.bf16.mxu0 %v5458_v54  ;;  %4724 = vmatprep.subr.bf16.mxu1 %v5459_v55 }
 0x58a   :  { %4703 = vmatpush3.bf16.msra.mxu0 %v5460_v56  ;;  %4725 = vmatpush3.bf16.msra.mxu1 %v5461_v57 }
 0x58b   :  { %4704 = vmatprep.subr.bf16.mxu0 %v5462_v58  ;;  %4726 = vmatprep.subr.bf16.mxu1 %v5463_v59 }
 0x58e   :  { %4705 = vmatpush3.bf16.msra.mxu0 %v5464_v60  ;;  %4727 = vmatpush3.bf16.msra.mxu1 %v5465_v61 }
 0x58f   :  { %4706 = vmatprep.subr.bf16.mxu0 %v5466_v62  ;;  %4728 = vmatprep.subr.bf16.mxu1 %v5467_v63 }
 0x592   :  { %4707 = vmatpush3.bf16.msra.mxu0 %v5468_v0  ;;  %4729 = vmatpush3.bf16.msra.mxu1 %v5469_v1  ;;  %v5497_v1 = vmov 0.0  }
 0x593   :  { %4708 = vmatprep.subr.bf16.mxu0 %v5470_v2  ;;  %4730 = vmatprep.subr.bf16.mxu1 %v5471_v3 }
 0x596   :  { %4709 = vmatpush3.bf16.msra.mxu0 %v5472_v4  ;;  %4731 = vmatpush3.bf16.msra.mxu1 %v5473_v5 }
 0x597   :  { %4710 = vmatprep.subr.bf16.mxu0 %v5474_v6  ;;  %4732 = vmatprep.subr.bf16.mxu1 %v5475_v7 }
 0x59a   :  { %4711 = vmatpush3.bf16.msra.mxu0 %v5476_v8  ;;  %4733 = vmatpush3.bf16.msra.mxu1 %v5477_v9 }
 0x59b   :  { %4712 = vmatprep.subr.bf16.mxu0 %v5478_v10  ;;  %4734 = vmatprep.subr.bf16.mxu1 %v5479_v11 }
 0x59e   :  { %4713 = vmatpush3.bf16.msra.mxu0 %v5480_v12  ;;  %4735 = vmatpush3.bf16.msra.mxu1 %v5481_v13 }
 0x59f   :  { %4714 = vmatprep.subr.bf16.mxu0 %v5482_v14  ;;  %4736 = vmatprep.subr.bf16.mxu1 %v5483_v16 }
 0x5a2   :  { %4715 = vmatpush3.bf16.msra.mxu0 %v5484_v17  ;;  %4737 = vmatpush3.bf16.msra.mxu1 %v5485_v18 }
 0x658   :  { %v3684_v30 = vpop.f32.mrb[16].mxu0  ;;  %v3766_v31 = vpop.f32.mrb[24].mxu1 }
 0x659   :  { %v4746_v32 = vadd.f32 %v3684_v30, %v2952_v25  ;;  %v4748_v33 = vadd.f32 %v3766_v31, %v2960_v26  ;;  %v3686_v34 = vpop.f32.mrb[17].mxu0  ;;  %v3768_v35 = vpop.f32.mrb[25].mxu1 }
 0x65a   :  { %v4747_v36 = vadd.f32 %v3686_v34, %v2956_v27  ;;  %v4749_v37 = vadd.f32 %v3768_v35, %v2964_v29  ;;  %v3688_v40 = vpop.f32.mrb[18].mxu0  ;;  %v3770_v41 = vpop.f32.mrb[26].mxu1 }
 0x65b   :  { %vm3773_vm1 = vcmp.ge.f32.partialorder %v4746_v32, 0.0  ;;  %v3777_v42 = vmul.f32 0.01, %v4746_v32  ;;  %vm3775_vm2 = vcmp.ge.f32.partialorder %v4748_v33, 0.0  ;;  %v3779_v22 = vmul.f32 0.01, %v4748_v33 }
 0x65c   :  { %vm3774_vm3 = vcmp.ge.f32.partialorder %v4747_v36, 0.0  ;;  %v3778_v38 = vmul.f32 0.01, %v4747_v36  ;;  %vm3776_vm4 = vcmp.ge.f32.partialorder %v4749_v37, 0.0  ;;  %v3780_v24 = vmul.f32 0.01, %v4749_v37 }
 0x65d   :  { %v3781_v21 = vsel %vm3773_vm1, %v4746_v32, %v3777_v42  ;;  %v3783_v28 = vsel %vm3775_vm2, %v4748_v33, %v3779_v22  ;;  %v3689_v15 = vpop.f32.mrb[19].mxu0  ;;  %v3771_v43 = vpop.f32.mrb[27].mxu1 }
 0x65e   :  { %v3782_v44 = vsel %vm3774_vm3, %v4747_v36, %v3778_v38  ;;  %v3784_v45 = vsel %vm3776_vm4, %v4749_v37, %v3780_v24  ;;  %v3785_v23 = vpack.c.bf16 %v3781_v21, %v3781_v21  ;;  %v3787_v47 = vpack.c.bf16 %v3783_v28, %v3783_v28 }
 0x65f   :  { %v3786_v46 = vpack.c.bf16 %v3782_v44, %v3782_v44  ;;  %v3788_v20 = vpack.c.bf16 %v3784_v45, %v3784_v45 }
 0x661   :  { %4077 = vmatprep.mubr.bf16.mxu0 %v3786_v46  ;;  %4117 = vmatprep.mubr.bf16.mxu1 %v3788_v20 }
 0x662   :  { %4078 = vmatmul.mubr.bf16.vlgmr.msra.gmra.mrb[20].mxu0 %v3785_v23  ;;  %4118 = vmatmul.mubr.bf16.vlgmr.msra.gmra.mrb[28].mxu1 %v3787_v47 }
 0x735   :  { %v4716_v48 = vpop.f32.mrb[20].mxu0  ;;  %v4738_v49 = vpop.f32.mrb[28].mxu1 }
 0x736   :  { %v4717_v50 = vpop.f32.mrb[21].mxu0  ;;  %v4739_v39 = vpop.f32.mrb[29].mxu1 }
 0x737   :  { %v4718_v51 = vadd.f32 %v4717_v50, %v4716_v48  ;;  %v4740_v52 = vadd.f32 %v4739_v39, %v4738_v49  ;;  %v4719_v53 = vpop.f32.mrb[22].mxu0  ;;  %v4741_v54 = vpop.f32.mrb[30].mxu1 }
 0x738   :  { %v4720_v55 = vpop.f32.mrb[23].mxu0  ;;  %v4742_v56 = vpop.f32.mrb[31].mxu1 }
 0x739   :  { %v4120_v57 = vadd.f32 %v4740_v52, %v4718_v51 }
 0x73b   :  { %vm4125_vm5 = vcmp.ge.f32.partialorder %v4120_v57, 0.0  ;;  %v4126_v58 = vmul.f32 0.01, %v4120_v57 }
 0x73d   :  { %v4127_v59 = vsel %vm4125_vm5, %v4120_v57, %v4126_v58 }
 0x73e   :  { %v4655_v60 = vmul.f32 -1.442695, %v4127_v59 }
 0x740   :  { %5490 = vpow2.f32 %v4655_v60 }
 0x74a   :  { %v5491_v61 = vpop.eup %5490 }
 0x74b   :  { %v4131_v62 = vadd.f32 1.0, %v5491_v61 }
 0x74d   :  { %5492 = vrcp.f32 %v4131_v62 }
 0x757   :  { %v5493_v63 = vpop.eup %5492 }
 0x758   :  { %4143 = vrot.lane.b32.xlu0 %v5493_v63, %s5496_s15 }
 0x7ca   :  { %v4144_v0 = vpop.permute.xlu0 %4143 }
 0x7cb   :  { %4147 = vst.msk [vmem:[%s7183_s17] sm:$0xff] %vm4146_vm6, %v4144_v0 }
 0x7cc   :  { %4149 = vst.msk [vmem:[%s7183_s17] sm:$0xff] %vm4148_vm7, %v5497_v1 }

</bundles_post_ra>
